<compile_context>
chip_gen: v5e
topology: v5e:2x2
jax: 0.10.0
libtpu: 0.0.40
codegen_flags: <defaults>
</compile_context>

<pallas_src>
import jax
import jax.numpy as jnp
from jax.experimental import pallas as pl
from jax.experimental.pallas import tpu as pltpu


# ----------------------------------------------------------------------------
# Host-side constant builders (computed once per shape, live in VMEM).
# ----------------------------------------------------------------------------
def _build_tap_masks(B, Hc, Wc):
    """(9, B*Hc*Wc) f32 validity masks for the 3x3 / padding=1 taps.

    Lane j holds image b = j // (Hc*Wc), pixel p = j % (Hc*Wc) (row-major).
    mask[k, j] == 1 iff the source pixel of tap k=(kh*3+kw) lies inside that
    image (i.e. would NOT come from the zero padding)."""
    HW = Hc * Wc
    p = jnp.arange(B * HW, dtype=jnp.int32) % HW
    h = p // Wc
    w = p % Wc
    rows = []
    for kh in range(3):
        for kw in range(3):
            row_ok = (h + (kh - 1) >= 0) & (h + (kh - 1) < Hc)
            col_ok = (w + (kw - 1) >= 0) & (w + (kw - 1) < Wc)
            rows.append((row_ok & col_ok).astype(jnp.float32))
    return jnp.stack(rows, axis=0)


def _build_pool_sel(B, Hc, Wc):
    """(B*Hc*Wc, B*Hc*Wc//4) 0/1 matrix: stride-2 lane compaction for
    MaxPool2d(2) in the batched (C, B*HW) layout (block-diagonal over B)."""
    HW, Hp, Wp = Hc * Wc, Hc // 2, Wc // 2
    HWp = Hp * Wp
    q = jnp.arange(B * HWp, dtype=jnp.int32)
    b = q // HWp
    pp = q % HWp
    src = b * HW + 2 * (pp // Wp) * Wc + 2 * (pp % Wp)          # (B*HWp,)
    r = jnp.arange(B * HW, dtype=jnp.int32)
    return (r[:, None] == src[None, :]).astype(jnp.float32)     # (B*HW, B*HWp)


# ----------------------------------------------------------------------------
# Fused kernel: all conv+ReLU+pool blocks in one body, intermediates on-chip.
# cfgs: list of (Cin, Cout, Hc, Wc) per conv block, in order.  B images/step.
# ----------------------------------------------------------------------------
def _make_kernel(cfgs, B):
    n = len(cfgs)

    def kernel(x_ref, *refs):
        w_refs = refs[0:3 * n:3]                 # (Cout, 9*Cin) im2col weights
        b_refs = refs[1:3 * n:3]                 # (Cout, 1) biases
        m_refs = refs[2:3 * n:3]                 # (9, B*HW) tap validity masks
        sel_refs = refs[3 * n:3 * n + (n - 1)]   # pool compaction matrices
        out_refs = refs[3 * n + (n - 1):]        # pre-pool activations (Cout, B*HW)

        cur = x_ref[...].astype(jnp.float32)     # (Cin0, B*H0*W0)
        for bi, (Cin, Cout, Hc, Wc) in enumerate(cfgs):
            L = B * Hc * Wc
            w = w_refs[bi][...]                  # (Cout, 9*Cin)
            b = b_refs[bi][...]                  # (Cout, 1)
            # 3x3 taps: lane roll (XLU) + precomputed mask multiply (VPU).
            taps = []
            for kh in range(3):
                for kw in range(3):
                    k = kh * 3 + kw
                    d = (kh - 1) * Wc + (kw - 1)     # flat offset of this tap
                    if d == 0:                       # centre tap: untouched
                        taps.append(cur)
                    else:
                        t = pltpu.roll(cur, (-d) % L, axis=1)   # t[j]=cur[j+d]
                        taps.append(t * m_refs[bi][k:k + 1, :]) # per-image padding
            # im2col: one (Cout, 9*Cin) @ (9*Cin, B*HW) MXU matmul (all blocks).
            patches = jnp.concatenate(taps, axis=0)  # row = (kh*3+kw)*Cin + c
            acc = jnp.dot(w, patches, preferred_element_type=jnp.float32)
            act = jnp.maximum(acc + b, 0.0)          # bias + ReLU (= module[:2])
            out_refs[bi][...] = act                  # lane-dense store

            if bi + 1 < n:                           # module[2:] feeds next block
                # MaxPool2d(2): pairwise maxima via lane rolls, then stride-2
                # lane compaction with the precomputed 0/1 selection matmul.
                m1 = jnp.maximum(act, pltpu.roll(act, L - 1, axis=1))   # vs j+1
                m2 = jnp.maximum(m1, pltpu.roll(m1, L - Wc, axis=1))    # vs j+Wc
                cur = jnp.dot(m2, sel_refs[bi][...],
                              preferred_element_type=jnp.float32)
            # Pool of the last block is dead code in the original forward
            # (only pre-pool activations are returned), so it is skipped.

    return kernel


def _make_fused_call(cfgs, B, S):
    n = len(cfgs)
    Cin0, _, H0, W0 = cfgs[0]
    L0 = B * H0 * W0

    in_specs = [pl.BlockSpec((None, Cin0, L0), lambda s: (s, 0, 0))]
    for (Cin, Cout, Hc, Wc) in cfgs:
        L = B * Hc * Wc
        in_specs.append(pl.BlockSpec((Cout, 9 * Cin), lambda s: (0, 0)))  # w
        in_specs.append(pl.BlockSpec((Cout, 1), lambda s: (0, 0)))        # b
        in_specs.append(pl.BlockSpec((9, L), lambda s: (0, 0)))           # masks
    for i in range(n - 1):
        _, _, Hc, Wc = cfgs[i]
        L = B * Hc * Wc
        in_specs.append(pl.BlockSpec((L, L // 4), lambda s: (0, 0)))      # sel

    out_specs, out_shapes = [], []
    flops = 0
    bytes_accessed = S * Cin0 * L0 * 4
    for i, (Cin, Cout, Hc, Wc) in enumerate(cfgs):
        L = B * Hc * Wc
        out_specs.append(pl.BlockSpec((None, Cout, L), lambda s: (s, 0, 0)))
        out_shapes.append(jax.ShapeDtypeStruct((S, Cout, L), jnp.float32))
        flops += S * (2 * Cout * 9 * Cin * L + 2 * Cout * L)
        bytes_accessed += (Cout * (9 * Cin + 1) + 9 * L) * 4 + S * Cout * L * 4
        if i + 1 < n:
            flops += S * 2 * Cout * L * (L // 4)        # pool selection matmul
            bytes_accessed += L * (L // 4) * 4

    return pl.pallas_call(
        _make_kernel(cfgs, B),
        out_shape=out_shapes,
        grid=(S,),
        in_specs=in_specs,
        out_specs=out_specs,
        compiler_params=pltpu.CompilerParams(dimension_semantics=("parallel",)),
        cost_estimate=pl.CostEstimate(flops=int(flops), transcendentals=0,
                                      bytes_accessed=int(bytes_accessed)),
    )


# ----------------------------------------------------------------------------
# The feature extractor (mirrors MNISTFeatureExtractor.forward exactly).
# ----------------------------------------------------------------------------
class MNISTFeatureExtractorPallas:
    """Returns the pre-pool (conv+ReLU) activations of the extracted layers (NCHW)."""

    def __init__(self, params, extracted_layers, images_per_step=4):
        self.names = list(params.keys())
        self.params = dict(params)            # name -> (w_hwio (3,3,Cin,Cout), bias (Cout,))
        self.extracted_layers = list(extracted_layers)
        self.stop_at = len(self.extracted_layers)
        self.images_per_step = int(images_per_step)
        # Fold each Conv2d weight into the (Cout, 9*Cin) im2col matrix once
        # (column index = (kh*3 + kw) * Cin + cin).
        self._mats = {}
        for name, (w_hwio, b) in self.params.items():
            kh, kw, cin, cout = w_hwio.shape
            assert (kh, kw) == (3, 3), "only 3x3 convs supported"
            w_mat = jnp.transpose(w_hwio, (3, 0, 1, 2)).reshape(cout, 9 * cin)
            self._mats[name] = (jnp.asarray(w_mat, jnp.float32),
                                jnp.asarray(b, jnp.float32).reshape(cout, 1))
        self._built = {}

    def _depth(self):
        """How many leading blocks the original forward actually executes."""
        count = 0
        for i, name in enumerate(self.names):
            if name in self.extracted_layers:
                count += 1
                if count == self.stop_at:
                    return i + 1
        return len(self.names)

    def _build(self, N, C, H, W, depth):
        B = max(1, min(self.images_per_step, N))
        S = -(-N // B)
        NB = S * B
        names_used = self.names[:depth]
        cfgs, hc, wc, cin = [], H, W, C
        for i, name in enumerate(names_used):
            w_hwio, _ = self.params[name]
            assert w_hwio.shape[2] == cin, "channel mismatch between blocks"
            cout = w_hwio.shape[3]
            cfgs.append((cin, cout, hc, wc))
            if i + 1 < depth:
                assert hc % 2 == 0 and wc % 2 == 0, "MaxPool2d(2) needs even H, W"
            cin, hc, wc = cout, hc // 2, wc // 2

        masks = [_build_tap_masks(B, h_, w_) for (_, _, h_, w_) in cfgs]
        sels = [_build_pool_sel(B, cfgs[i][2], cfgs[i][3]) for i in range(len(cfgs) - 1)]
        fused = _make_fused_call(cfgs, B, S)

        def run(x_nchw, *wb):
            xp = x_nchw
            if NB != N:
                xp = jnp.pad(xp, ((0, NB - N), (0, 0), (0, 0), (0, 0)))
            # (NB,C,H,W) -> (S, C, B*H*W): image index is the outer part of the lane axis.
            x_packed = (xp.reshape(S, B, C, H * W)
                          .transpose(0, 2, 1, 3)
                          .reshape(S, C, B * H * W))
            args = [x_packed]
            for bi in range(len(cfgs)):
                args.extend([wb[2 * bi], wb[2 * bi + 1], masks[bi]])
            args.extend(sels)
            feats = fused(*args)
            outs = []
            for f, (_, co, h_, w_) in zip(feats, cfgs):
                o = (f.reshape(S, co, B, h_, w_)
                      .transpose(0, 2, 1, 3, 4)
                      .reshape(NB, co, h_, w_))
                outs.append(o[:N])
            return outs

        return jax.jit(run), cfgs

    def __call__(self, x_nchw):
        N, C, H, W = x_nchw.shape
        depth = self._depth()
        key = (N, C, H, W, depth)
        if key not in self._built:
            self._built[key] = self._build(N, C, H, W, depth)
        run, _ = self._built[key]
        wb = []
        for name in self.names[:depth]:
            wb.extend(self._mats[name])
        feats = run(x_nchw, *wb)
        # Replay the original extraction loop (semantics preserved exactly).
        outputs, count = [], 0
        for i, name in enumerate(self.names[:depth]):
            if name in self.extracted_layers:
                count += 1
                outputs.append(feats[i])
                if count == self.stop_at:
                    return outputs
        return outputs


# ----------------------------------------------------------------------------
# Synthetic weights + pure-JAX reference for the self-test.
# ----------------------------------------------------------------------------
def init_params(key):
    """Deterministic synthetic weights for the 2-block MNIST CNN (HWIO)."""
    k1, k2, k3, k4 = jax.random.split(key, 4)
    w1 = 0.1 * jax.random.normal(k1, (3, 3, 1, 8), jnp.float32)
    b1 = 0.1 * jax.random.normal(k2, (8,), jnp.float32)
    w2 = 0.1 * jax.random.normal(k3, (3, 3, 8, 16), jnp.float32)
    b2 = 0.1 * jax.random.normal(k4, (16,), jnp.float32)
    return {"block1": (w1, b1), "block2": (w2, b2)}


def _ref_forward(x_nchw, params, extracted):
    """Pure-JAX reference of the same forward (for correctness checking)."""
    outs = []
    x_prev = x_nchw
    for name, (w_hwio, b) in params.items():
        w_oihw = jnp.transpose(w_hwio, (3, 2, 0, 1))
        y = jax.lax.conv_general_dilated(
            x_prev, w_oihw, window_strides=(1, 1), padding=((1, 1), (1, 1)),
            dimension_numbers=("NCHW", "OIHW", "NCHW"))
        y = jnp.maximum(y + b[None, :, None, None], 0.0)
        x_prev = jax.lax.reduce_window(y, -jnp.inf, jax.lax.max,
                                       (1, 1, 2, 2), (1, 1, 2, 2), "VALID")
        if name in extracted:
            outs.append(y)
            if len(outs) == len(extracted):
                return outs
    return outs


if __name__ == "__main__":
    key = jax.random.PRNGKey(0)
    kx, kp = jax.random.split(key)

    # NCHW input, MNIST-like single channel.  N=8 with B=4 -> grid=(2,), so
    # both v7x TensorCores receive a grid step.
    x = jax.random.normal(kx, (8, 1, 16, 16), jnp.float32)
    params = init_params(kp)
    extracted = ["block1", "block2"]

    extractor = MNISTFeatureExtractorPallas(params, extracted, images_per_step=4)
    outs = extractor(x)
    outs = jax.block_until_ready(outs)

    refs = _ref_forward(x, params, extracted)
    assert len(outs) == len(refs)
    for o, r in zip(outs, refs):
        assert o.shape == r.shape, (o.shape, r.shape)
        assert jnp.allclose(o, r, atol=1e-4, rtol=1e-4), \
            float(jnp.max(jnp.abs(o - r)))

    print("KERNEL_OK")
</pallas_src>

<mosaic_0001>
module attributes {stable_mosaic.version = 11 : i64} {
  func.func @kernel(%arg0: i32, %arg1: memref<1x1x1024xf32, #tpu.memory_space<vmem>>, %arg2: memref<8x9xf32, #tpu.memory_space<vmem>>, %arg3: memref<8x1xf32, #tpu.memory_space<vmem>>, %arg4: memref<9x1024xf32, #tpu.memory_space<vmem>>, %arg5: memref<16x72xf32, #tpu.memory_space<vmem>>, %arg6: memref<16x1xf32, #tpu.memory_space<vmem>>, %arg7: memref<9x256xf32, #tpu.memory_space<vmem>>, %arg8: memref<1024x256xf32, #tpu.memory_space<vmem>>, %arg9: memref<1x8x1024xf32, #tpu.memory_space<vmem>>, %arg10: memref<1x16x256xf32, #tpu.memory_space<vmem>>) attributes {dimension_semantics = [#tpu.dimension_semantics<parallel>], iteration_bounds = array<i64: 2>, scalar_prefetch = 0 : i64, scratch_operands = 0 : i64, tpu.core_type = #tpu.core_type<tc>, window_params = [{transform_indices = @transform_0, window_bounds = array<i64: 1, 1, 1024>}, {pipeline_mode = #tpu.pipeline_mode<synchronous>, transform_indices = @transform_1, window_bounds = array<i64: 8, 9>}, {pipeline_mode = #tpu.pipeline_mode<synchronous>, transform_indices = @transform_2, window_bounds = array<i64: 8, 1>}, {pipeline_mode = #tpu.pipeline_mode<synchronous>, transform_indices = @transform_3, window_bounds = array<i64: 9, 1024>}, {pipeline_mode = #tpu.pipeline_mode<synchronous>, transform_indices = @transform_4, window_bounds = array<i64: 16, 72>}, {pipeline_mode = #tpu.pipeline_mode<synchronous>, transform_indices = @transform_5, window_bounds = array<i64: 16, 1>}, {pipeline_mode = #tpu.pipeline_mode<synchronous>, transform_indices = @transform_6, window_bounds = array<i64: 9, 256>}, {pipeline_mode = #tpu.pipeline_mode<synchronous>, transform_indices = @transform_7, window_bounds = array<i64: 1024, 256>}, {transform_indices = @transform_8, window_bounds = array<i64: 1, 8, 1024>}, {transform_indices = @transform_9, window_bounds = array<i64: 1, 16, 256>}]} {
    %c0 = arith.constant 0 : index
    %c0_0 = arith.constant 0 : index
    %c0_1 = arith.constant 0 : index
    %0 = vector.load %arg1[%c0, %c0_0, %c0_1] : memref<1x1x1024xf32, #tpu.memory_space<vmem>>, vector<1x1x1024xf32>
    %1 = vector.shape_cast %0 : vector<1x1x1024xf32> to vector<1x1024xf32>
    %c0_2 = arith.constant 0 : index
    %c0_3 = arith.constant 0 : index
    %2 = vector.load %arg2[%c0_2, %c0_3] : memref<8x9xf32, #tpu.memory_space<vmem>>, vector<8x9xf32>
    %c0_4 = arith.constant 0 : index
    %c0_5 = arith.constant 0 : index
    %3 = vector.load %arg3[%c0_4, %c0_5] : memref<8x1xf32, #tpu.memory_space<vmem>>, vector<8x1xf32>
    %c17_i32 = arith.constant 17 : i32
    %4 = tpu.dynamic_rotate %1 by %c17_i32 dim 1 : vector<1x1024xf32>, i32 -> vector<1x1024xf32>
    %c0_6 = arith.constant 0 : index
    %c0_7 = arith.constant 0 : index
    %5 = vector.load %arg4[%c0_6, %c0_7] : memref<9x1024xf32, #tpu.memory_space<vmem>>, vector<1x1024xf32>
    %6 = arith.mulf %4, %5 : vector<1x1024xf32>
    %c16_i32 = arith.constant 16 : i32
    %7 = tpu.dynamic_rotate %1 by %c16_i32 dim 1 : vector<1x1024xf32>, i32 -> vector<1x1024xf32>
    %c1 = arith.constant 1 : index
    %c0_8 = arith.constant 0 : index
    %8 = vector.load %arg4[%c1, %c0_8] : memref<9x1024xf32, #tpu.memory_space<vmem>>, vector<1x1024xf32>
    %9 = arith.mulf %7, %8 : vector<1x1024xf32>
    %c15_i32 = arith.constant 15 : i32
    %10 = tpu.dynamic_rotate %1 by %c15_i32 dim 1 : vector<1x1024xf32>, i32 -> vector<1x1024xf32>
    %c2 = arith.constant 2 : index
    %c0_9 = arith.constant 0 : index
    %11 = vector.load %arg4[%c2, %c0_9] : memref<9x1024xf32, #tpu.memory_space<vmem>>, vector<1x1024xf32>
    %12 = arith.mulf %10, %11 : vector<1x1024xf32>
    %c1_i32 = arith.constant 1 : i32
    %13 = tpu.dynamic_rotate %1 by %c1_i32 dim 1 : vector<1x1024xf32>, i32 -> vector<1x1024xf32>
    %c3 = arith.constant 3 : index
    %c0_10 = arith.constant 0 : index
    %14 = vector.load %arg4[%c3, %c0_10] : memref<9x1024xf32, #tpu.memory_space<vmem>>, vector<1x1024xf32>
    %15 = arith.mulf %13, %14 : vector<1x1024xf32>
    %c1023_i32 = arith.constant 1023 : i32
    %16 = tpu.dynamic_rotate %1 by %c1023_i32 dim 1 : vector<1x1024xf32>, i32 -> vector<1x1024xf32>
    %c5 = arith.constant 5 : index
    %c0_11 = arith.constant 0 : index
    %17 = vector.load %arg4[%c5, %c0_11] : memref<9x1024xf32, #tpu.memory_space<vmem>>, vector<1x1024xf32>
    %18 = arith.mulf %16, %17 : vector<1x1024xf32>
    %c1009_i32 = arith.constant 1009 : i32
    %19 = tpu.dynamic_rotate %1 by %c1009_i32 dim 1 : vector<1x1024xf32>, i32 -> vector<1x1024xf32>
    %c6 = arith.constant 6 : index
    %c0_12 = arith.constant 0 : index
    %20 = vector.load %arg4[%c6, %c0_12] : memref<9x1024xf32, #tpu.memory_space<vmem>>, vector<1x1024xf32>
    %21 = arith.mulf %19, %20 : vector<1x1024xf32>
    %c1008_i32 = arith.constant 1008 : i32
    %22 = tpu.dynamic_rotate %1 by %c1008_i32 dim 1 : vector<1x1024xf32>, i32 -> vector<1x1024xf32>
    %c7 = arith.constant 7 : index
    %c0_13 = arith.constant 0 : index
    %23 = vector.load %arg4[%c7, %c0_13] : memref<9x1024xf32, #tpu.memory_space<vmem>>, vector<1x1024xf32>
    %24 = arith.mulf %22, %23 : vector<1x1024xf32>
    %c1007_i32 = arith.constant 1007 : i32
    %25 = tpu.dynamic_rotate %1 by %c1007_i32 dim 1 : vector<1x1024xf32>, i32 -> vector<1x1024xf32>
    %c8 = arith.constant 8 : index
    %c0_14 = arith.constant 0 : index
    %26 = vector.load %arg4[%c8, %c0_14] : memref<9x1024xf32, #tpu.memory_space<vmem>>, vector<1x1024xf32>
    %27 = arith.mulf %25, %26 : vector<1x1024xf32>
    %28 = tpu.concatenate %6, %9, %12, %15, %1, %18, %21, %24, %27 in 0 : vector<1x1024xf32>, vector<1x1024xf32>, vector<1x1024xf32>, vector<1x1024xf32>, vector<1x1024xf32>, vector<1x1024xf32>, vector<1x1024xf32>, vector<1x1024xf32>, vector<1x1024xf32> -> vector<9x1024xf32>
    %cst = arith.constant dense<0.000000e+00> : vector<8x1024xf32>
    %29 = tpu.matmul %2, %28, %cst {dimension_numbers = #tpu.dot_dimension_numbers<[1], [0], [0], [1], [0, 0, 1, 1], [], []>} : vector<8x9xf32>, vector<9x1024xf32>, vector<8x1024xf32> -> vector<8x1024xf32>
    %30 = vector.broadcast %3 : vector<8x1xf32> to vector<8x1024xf32>
    %31 = arith.addf %29, %30 : vector<8x1024xf32>
    %cst_15 = arith.constant 0.000000e+00 : f32
    %32 = vector.broadcast %cst_15 : f32 to vector<8x1024xf32>
    %33 = arith.maximumf %31, %32 : vector<8x1024xf32>
    %c0_16 = arith.constant 0 : index
    %c0_17 = arith.constant 0 : index
    %c0_18 = arith.constant 0 : index
    %34 = vector.load %arg9[%c0_16, %c0_17, %c0_18] : memref<1x8x1024xf32, #tpu.memory_space<vmem>>, vector<1x8x1024xf32>
    %35 = vector.shape_cast %34 : vector<1x8x1024xf32> to vector<8x1024xf32>
    %36 = vector.shape_cast %33 : vector<8x1024xf32> to vector<1x8x1024xf32>
    tpu.vector_store %arg9[%c0_16, %c0_17, %c0_18], %36 {strides = array<i32>} : memref<1x8x1024xf32, #tpu.memory_space<vmem>>, vector<1x8x1024xf32>,
    %c1023_i32_19 = arith.constant 1023 : i32
    %37 = tpu.dynamic_rotate %33 by %c1023_i32_19 dim 1 : vector<8x1024xf32>, i32 -> vector<8x1024xf32>
    %38 = arith.maximumf %33, %37 : vector<8x1024xf32>
    %c1008_i32_20 = arith.constant 1008 : i32
    %39 = tpu.dynamic_rotate %38 by %c1008_i32_20 dim 1 : vector<8x1024xf32>, i32 -> vector<8x1024xf32>
    %40 = arith.maximumf %38, %39 : vector<8x1024xf32>
    %c0_21 = arith.constant 0 : index
    %c0_22 = arith.constant 0 : index
    %41 = vector.load %arg8[%c0_21, %c0_22] : memref<1024x256xf32, #tpu.memory_space<vmem>>, vector<1024x256xf32>
    %cst_23 = arith.constant dense<0.000000e+00> : vector<8x256xf32>
    %42 = tpu.matmul %40, %41, %cst_23 {dimension_numbers = #tpu.dot_dimension_numbers<[1], [0], [0], [1], [0, 0, 1, 1], [], []>} : vector<8x1024xf32>, vector<1024x256xf32>, vector<8x256xf32> -> vector<8x256xf32>
    %c0_24 = arith.constant 0 : index
    %c0_25 = arith.constant 0 : index
    %43 = vector.load %arg5[%c0_24, %c0_25] : memref<16x72xf32, #tpu.memory_space<vmem>>, vector<16x72xf32>
    %c0_26 = arith.constant 0 : index
    %c0_27 = arith.constant 0 : index
    %44 = vector.load %arg6[%c0_26, %c0_27] : memref<16x1xf32, #tpu.memory_space<vmem>>, vector<16x1xf32>
    %c9_i32 = arith.constant 9 : i32
    %45 = tpu.dynamic_rotate %42 by %c9_i32 dim 1 : vector<8x256xf32>, i32 -> vector<8x256xf32>
    %c0_28 = arith.constant 0 : index
    %c0_29 = arith.constant 0 : index
    %46 = vector.load %arg7[%c0_28, %c0_29] : memref<9x256xf32, #tpu.memory_space<vmem>>, vector<1x256xf32>
    %47 = vector.broadcast %46 : vector<1x256xf32> to vector<8x256xf32>
    %48 = arith.mulf %45, %47 : vector<8x256xf32>
    %c8_i32 = arith.constant 8 : i32
    %49 = tpu.dynamic_rotate %42 by %c8_i32 dim 1 : vector<8x256xf32>, i32 -> vector<8x256xf32>
    %c1_30 = arith.constant 1 : index
    %c0_31 = arith.constant 0 : index
    %50 = vector.load %arg7[%c1_30, %c0_31] : memref<9x256xf32, #tpu.memory_space<vmem>>, vector<1x256xf32>
    %51 = vector.broadcast %50 : vector<1x256xf32> to vector<8x256xf32>
    %52 = arith.mulf %49, %51 : vector<8x256xf32>
    %c7_i32 = arith.constant 7 : i32
    %53 = tpu.dynamic_rotate %42 by %c7_i32 dim 1 : vector<8x256xf32>, i32 -> vector<8x256xf32>
    %c2_32 = arith.constant 2 : index
    %c0_33 = arith.constant 0 : index
    %54 = vector.load %arg7[%c2_32, %c0_33] : memref<9x256xf32, #tpu.memory_space<vmem>>, vector<1x256xf32>
    %55 = vector.broadcast %54 : vector<1x256xf32> to vector<8x256xf32>
    %56 = arith.mulf %53, %55 : vector<8x256xf32>
    %c1_i32_34 = arith.constant 1 : i32
    %57 = tpu.dynamic_rotate %42 by %c1_i32_34 dim 1 : vector<8x256xf32>, i32 -> vector<8x256xf32>
    %c3_35 = arith.constant 3 : index
    %c0_36 = arith.constant 0 : index
    %58 = vector.load %arg7[%c3_35, %c0_36] : memref<9x256xf32, #tpu.memory_space<vmem>>, vector<1x256xf32>
    %59 = vector.broadcast %58 : vector<1x256xf32> to vector<8x256xf32>
    %60 = arith.mulf %57, %59 : vector<8x256xf32>
    %c255_i32 = arith.constant 255 : i32
    %61 = tpu.dynamic_rotate %42 by %c255_i32 dim 1 : vector<8x256xf32>, i32 -> vector<8x256xf32>
    %c5_37 = arith.constant 5 : index
    %c0_38 = arith.constant 0 : index
    %62 = vector.load %arg7[%c5_37, %c0_38] : memref<9x256xf32, #tpu.memory_space<vmem>>, vector<1x256xf32>
    %63 = vector.broadcast %62 : vector<1x256xf32> to vector<8x256xf32>
    %64 = arith.mulf %61, %63 : vector<8x256xf32>
    %c249_i32 = arith.constant 249 : i32
    %65 = tpu.dynamic_rotate %42 by %c249_i32 dim 1 : vector<8x256xf32>, i32 -> vector<8x256xf32>
    %c6_39 = arith.constant 6 : index
    %c0_40 = arith.constant 0 : index
    %66 = vector.load %arg7[%c6_39, %c0_40] : memref<9x256xf32, #tpu.memory_space<vmem>>, vector<1x256xf32>
    %67 = vector.broadcast %66 : vector<1x256xf32> to vector<8x256xf32>
    %68 = arith.mulf %65, %67 : vector<8x256xf32>
    %c248_i32 = arith.constant 248 : i32
    %69 = tpu.dynamic_rotate %42 by %c248_i32 dim 1 : vector<8x256xf32>, i32 -> vector<8x256xf32>
    %c7_41 = arith.constant 7 : index
    %c0_42 = arith.constant 0 : index
    %70 = vector.load %arg7[%c7_41, %c0_42] : memref<9x256xf32, #tpu.memory_space<vmem>>, vector<1x256xf32>
    %71 = vector.broadcast %70 : vector<1x256xf32> to vector<8x256xf32>
    %72 = arith.mulf %69, %71 : vector<8x256xf32>
    %c247_i32 = arith.constant 247 : i32
    %73 = tpu.dynamic_rotate %42 by %c247_i32 dim 1 : vector<8x256xf32>, i32 -> vector<8x256xf32>
    %c8_43 = arith.constant 8 : index
    %c0_44 = arith.constant 0 : index
    %74 = vector.load %arg7[%c8_43, %c0_44] : memref<9x256xf32, #tpu.memory_space<vmem>>, vector<1x256xf32>
    %75 = vector.broadcast %74 : vector<1x256xf32> to vector<8x256xf32>
    %76 = arith.mulf %73, %75 : vector<8x256xf32>
    %77 = tpu.concatenate %48, %52, %56, %60, %42, %64, %68, %72, %76 in 0 : vector<8x256xf32>, vector<8x256xf32>, vector<8x256xf32>, vector<8x256xf32>, vector<8x256xf32>, vector<8x256xf32>, vector<8x256xf32>, vector<8x256xf32>, vector<8x256xf32> -> vector<72x256xf32>
    %cst_45 = arith.constant dense<0.000000e+00> : vector<16x256xf32>
    %78 = tpu.matmul %43, %77, %cst_45 {dimension_numbers = #tpu.dot_dimension_numbers<[1], [0], [0], [1], [0, 0, 1, 1], [], []>} : vector<16x72xf32>, vector<72x256xf32>, vector<16x256xf32> -> vector<16x256xf32>
    %79 = vector.broadcast %44 : vector<16x1xf32> to vector<16x256xf32>
    %80 = arith.addf %78, %79 : vector<16x256xf32>
    %cst_46 = arith.constant 0.000000e+00 : f32
    %81 = vector.broadcast %cst_46 : f32 to vector<16x256xf32>
    %82 = arith.maximumf %80, %81 : vector<16x256xf32>
    %c0_47 = arith.constant 0 : index
    %c0_48 = arith.constant 0 : index
    %c0_49 = arith.constant 0 : index
    %83 = vector.load %arg10[%c0_47, %c0_48, %c0_49] : memref<1x16x256xf32, #tpu.memory_space<vmem>>, vector<1x16x256xf32>
    %84 = vector.shape_cast %83 : vector<1x16x256xf32> to vector<16x256xf32>
    %85 = vector.shape_cast %82 : vector<16x256xf32> to vector<1x16x256xf32>
    tpu.vector_store %arg10[%c0_47, %c0_48, %c0_49], %85 {strides = array<i32>} : memref<1x16x256xf32, #tpu.memory_space<vmem>>, vector<1x16x256xf32>,
    return
  }
  func.func @transform_0(%arg0: i32) -> (i32, i32, i32) {
    %c0_i32 = arith.constant 0 : i32
    %c0_i32_0 = arith.constant 0 : i32
    %c0_i32_1 = arith.constant 0 : i32
    return %arg0, %c0_i32, %c0_i32_0 : i32, i32, i32
  }
  func.func @transform_1(%arg0: i32) -> (i32, i32) {
    %c0_i32 = arith.constant 0 : i32
    %c0_i32_0 = arith.constant 0 : i32
    %c0_i32_1 = arith.constant 0 : i32
    return %c0_i32, %c0_i32_0 : i32, i32
  }
  func.func @transform_2(%arg0: i32) -> (i32, i32) {
    %c0_i32 = arith.constant 0 : i32
    %c0_i32_0 = arith.constant 0 : i32
    %c0_i32_1 = arith.constant 0 : i32
    return %c0_i32, %c0_i32_0 : i32, i32
  }
  func.func @transform_3(%arg0: i32) -> (i32, i32) {
    %c0_i32 = arith.constant 0 : i32
    %c0_i32_0 = arith.constant 0 : i32
    %c0_i32_1 = arith.constant 0 : i32
    return %c0_i32, %c0_i32_0 : i32, i32
  }
  func.func @transform_4(%arg0: i32) -> (i32, i32) {
    %c0_i32 = arith.constant 0 : i32
    %c0_i32_0 = arith.constant 0 : i32
    %c0_i32_1 = arith.constant 0 : i32
    return %c0_i32, %c0_i32_0 : i32, i32
  }
  func.func @transform_5(%arg0: i32) -> (i32, i32) {
    %c0_i32 = arith.constant 0 : i32
    %c0_i32_0 = arith.constant 0 : i32
    %c0_i32_1 = arith.constant 0 : i32
    return %c0_i32, %c0_i32_0 : i32, i32
  }
  func.func @transform_6(%arg0: i32) -> (i32, i32) {
    %c0_i32 = arith.constant 0 : i32
    %c0_i32_0 = arith.constant 0 : i32
    %c0_i32_1 = arith.constant 0 : i32
    return %c0_i32, %c0_i32_0 : i32, i32
  }
  func.func @transform_7(%arg0: i32) -> (i32, i32) {
    %c0_i32 = arith.constant 0 : i32
    %c0_i32_0 = arith.constant 0 : i32
    %c0_i32_1 = arith.constant 0 : i32
    return %c0_i32, %c0_i32_0 : i32, i32
  }
  func.func @transform_8(%arg0: i32) -> (i32, i32, i32) {
    %c0_i32 = arith.constant 0 : i32
    %c0_i32_0 = arith.constant 0 : i32
    %c0_i32_1 = arith.constant 0 : i32
    return %arg0, %c0_i32, %c0_i32_0 : i32, i32, i32
  }
  func.func @transform_9(%arg0: i32) -> (i32, i32, i32) {
    %c0_i32 = arith.constant 0 : i32
    %c0_i32_0 = arith.constant 0 : i32
    %c0_i32_1 = arith.constant 0 : i32
    return %arg0, %c0_i32, %c0_i32_0 : i32, i32, i32
  }
}

</mosaic_0001>

<bundles_post_ra>
// kernel: run.1
= control target key start
LH: loop header
LB: loop body
LE: loop exit
PB: predicated region body
PF: predicated region fallthrough
CT: control target
= control target key end

     0   :  { %15 = vsyncpa [#allocation3], 0  ;;  %s3453_s0 = inlined_call_operand.vmem [shape: f32[2,1,1024], index: 0, kind: input, shape index: {}]   ;;  %s3454_s1 = inlined_call_operand.hbm [shape: f32[8,9], index: 1, kind: input, shape index: {}]   ;;  %s3455_s2 = inlined_call_operand.vmem [shape: f32[8,1], index: 2, kind: input, shape index: {}]   ;;  %s3456_s3 = inlined_call_operand.vmem [shape: f32[9,1024], index: 3, kind: input, shape index: {}]   ;;  %s3457_s4 = inlined_call_operand.vmem [shape: f32[16,72], index: 4, kind: input, shape index: {}]   ;;  %s3458_s5 = inlined_call_operand.vmem [shape: f32[16,1], index: 5, kind: input, shape index: {}]   ;;  %s3459_s6 = inlined_call_operand.vmem [shape: f32[9,256], index: 6, kind: input, shape index: {}]   ;;  %s3460_s7 = inlined_call_operand.hbm [shape: f32[1024,256], index: 7, kind: input, shape index: {}]   ;;  %s3461_s8 = inlined_call_operand.vmem [shape: f32[2,8,1024], index: 8, kind: output, shape index: {0}]   ;;  %s3462_s9 = inlined_call_operand.vmem [shape: f32[2,16,256], index: 9, kind: output, shape index: {1}]  }
   0x1   :  { %16 = vsyncpa [#allocation5], 0  ;;  %s2487_s30 = smov 0  }
   0x2 LB: > { %s264_s12 = sshll.u32 %s3454_s1, 4  ;;  %s2194_s13 = sadd.s32 4294967295, %s2416_s30   ;;  %s2416_s30 = sphi %s2487_s30, %s22_s30   ;;  %s265_s12 = int_to_ptr.hbm [resolvable:$true] %s264_s12 }
   0x3   : > { %p2196_p0 = scmp.ge.s32.totalorder %s2416_s30, 1  ;;  %p252_p1 = scmp.lt.s32.totalorder %s2416_s30, 3 }
   0x4   : > { %p2268_p2 = scmp.eq.s32.totalorder %s2194_s13, 0  ;;  %s2418_s15 = smov [#allocation2]  }
   0x5   : > { %p2498_p3 = pnand %p2196_p0, %p252_p1  ;;  %s266_s16 = sshll.u32 %s2418_s15, 4  ;;  %s267_s16 = int_to_ptr.vmem [resolvable:$true] %s266_s16 }
   0x6   : > { %s290_s19 = sshll.u32 %s3460_s7, 4  ;;  %s2419_s20 = smov [#allocation4]   ;;  %s291_s19 = int_to_ptr.hbm [resolvable:$true] %s290_s19 }
   0x7   : > { %p2261_p4 = pneg %p2498_p3  ;;  %s292_s21 = sshll.u32 %s2419_s20, 4  ;;  %s293_s21 = int_to_ptr.vmem [resolvable:$true] %s292_s21 }
   0x8   : > { %s2420_s22 = smov 256   ;;  %s2421_s23 = smov 16  }
   0x9   : > { %p2262_p5 = pnand %p2268_p2, %p2261_p4  ;;  %315 = sbr.rel (%p2498_p3) target bundleno = 1155 (0x483), region = 52 }
   0xb   : > { %2264 = dma.hbm_to_vmem [thread:$0]  (!%p2262_p5), %s265_s12, 128, %s267_s16, [#allocation3]  }
   0xc   : > { %2267 = dma.hbm_to_vmem [thread:$0]  (!%p2262_p5), %s291_s19, 32768, %s293_s21, [#allocation5], %s2420_s22, %s2420_s22, %s2421_s23  }
   0xe   : > { %2407 = dma.done.wait (%p2268_p2), [#allocation3], 128  }
   0xf   : > { %2409 = vsyncadd (%p2268_p2), [#allocation3], 4294967168 }
  0x10   : > { %2411 = dma.done.wait (%p2268_p2), [#allocation5], 32768  }
  0x11   : > { %2413 = vsyncadd (%p2268_p2), [#allocation5], 4294934528  ;;  %p361_p6 = scmp.lt.s32.totalorder %s2194_s13, 1  ;;  %s2422_s28 = smov 16   ;;  %v411_v21 = vlaneseq  ;;  %vm972_vm3 = vcmask 1040384   ;;  %vm981_vm5 = vcmask 1041408  }
  0x12   : > { %s2423_s29 = smov 15   ;;  %s2424_s10 = smov 17   ;;  %v2208_v25 = vld [vmem:[%s3456_s3 + $0x1] ss:$8 sm:$0xf]  ;;  %vm990_vm7 = vcmask 1042432  }
  0x13   : > { %s3474_s13 = smov (!%p361_p6, %s2194_s13), 1  ;;  %s2425_s11 = smov 1   ;;  %v2687_v26 = vand.u32 127, %v411_v21  ;;  %v2209_v27 = vld [vmem:[%s3456_s3 + $0x1] ss:$8 sm:$0xf0] }
  0x14   : > { %s2203_s24 = sshll.u32 %s3474_s13, 3  ;;  %s2426_s12 = smov 127   ;;  %v2696_v28 = vor.u32 %v2209_v27, %v2208_v25  ;;  %v2210_v29 = vld [vmem:[%s3456_s3 + $0x2] ss:$8 sm:$0xf]  ;;  %vm999_vm10 = vcmask 1043456  }
  0x15   : > { %s364_s27 = scalar_lea.vmem %s3453_s0, %s2203_s24  ;;  %s2427_s14 = smov 113   ;;  %v2211_v30 = vld [vmem:[%s3456_s3 + $0x2] ss:$8 sm:$0xf0]  ;;  %vm466_vm0 = vcmp.lt.s32.totalorder %v2687_v26, 16  ;;  %vm520_vm1 = vcmp.lt.s32.totalorder %v2687_v26, 15 }
  0x16   : > { %v2520_v0 = vld [vmem:[%s364_s27] sm:$0xff]  ;;  %s2428_s15 = smov 112   ;;  %s2429_s16 = smov 111   ;;  %v2719_v36 = vor.u32 %v2211_v30, %v2210_v29  ;;  %v480_v39 = vperm.slane %v2696_v28, 0  ;;  %v481_v47 = vperm.slane %v2696_v28, 1  ;;  %vm413_vm2 = vcmp.lt.s32.totalorder %v2687_v26, 17 }
  0x17   : > { %v2523_v1 = vperm.slane %v2520_v0, 7  ;;  %v2526_v2 = vperm.slane %v2520_v0, 1  ;;  %v2529_v3 = vperm.slane %v2520_v0, 0  ;;  %v2556_v4 = vperm.slane %v2520_v0, 2  ;;  %s2251_s23 = sshll.u32 %s3474_s13, 6  ;;  %s2432_s27 = smov 120  }
  0x18   : > { %v2583_v5 = vperm.slane %v2520_v0, 3  ;;  %v2604_v6 = vperm.slane %v2520_v0, 4  ;;  %v2623_v9 = vperm.slane %v2520_v0, 5  ;;  %v2658_v17 = vperm.slane %v2520_v0, 6  ;;  %s3202_s26 = scalar_lea.vmem %s3461_s8, %s2251_s23  ;;  %s2436_s17 = smov 9  }
  0x19   : > { %464 = vrot.lane.b32.xlu1 %v2523_v1, %s2422_s28  ;;  %506 = vrot.lane.b32.xlu2 %v2526_v2, %s2423_s29  ;;  %v422_v33 = vld [vmem:[%s3456_s3] ss:$8 sm:$0xf]  ;;  %v2212_v37 = vld [vmem:[%s3456_s3 + $0x3] ss:$8 sm:$0xf] }
  0x1a   : > { %450 = vrot.lane.b32.xlu0 %v2529_v3, %s2422_s28  ;;  %3467 = vst [vmem:[#allocation8_spill] sm:$0xff] %v2658_v17  ;;  %v423_v34 = vld [vmem:[%s3456_s3] ss:$8 sm:$0xf0]  ;;  %v534_v45 = vperm.slane %v2719_v36, 0  ;;  %v535_v46 = vperm.slane %v2719_v36, 1 }
  0x1b   : > { %v2213_v38 = vld [vmem:[%s3456_s3 + $0x3] ss:$8 sm:$0xf0]  ;;  %v2732_v41 = vor.u32 %v423_v34, %v422_v33  ;;  %v2214_v42 = vld [vmem:[%s3456_s3 + $0x5] ss:$8 sm:$0xf] }
  0x1c   : > { %v2215_v43 = vld [vmem:[%s3456_s3 + $0x5] ss:$8 sm:$0xf0]  ;;  %v2740_v44 = vor.u32 %v2213_v38, %v2212_v37  ;;  %v2216_v50 = vld [vmem:[%s3456_s3 + $0x6] ss:$8 sm:$0xf] }
  0x1d   : > { %v2752_v49 = vor.u32 %v2215_v43, %v2214_v42  ;;  %v2217_v51 = vld [vmem:[%s3456_s3 + $0x6] ss:$8 sm:$0xf0]  ;;  %v426_v52 = vperm.slane %v2732_v41, 0  ;;  %v427_v53 = vperm.slane %v2732_v41, 1  ;;  %vm574_vm4 = vcmp.lt.s32.totalorder %v2687_v26, 1 }
  0x1e   : > { %v588_v57 = vperm.slane %v2740_v44, 0  ;;  %v589_v58 = vperm.slane %v2740_v44, 1  ;;  %v2780_v61 = vor.u32 %v2217_v51, %v2216_v50  ;;  %v2218_v62 = vld [vmem:[%s3456_s3 + $0x7] ss:$8 sm:$0xf]  ;;  %vm628_vm6 = vcmp.lt.s32.totalorder %v2687_v26, 127 }
  0x1f   : > { %v2219_v63 = vld [vmem:[%s3456_s3 + $0x7] ss:$8 sm:$0xf0]  ;;  %v643_v21 = vperm.slane %v2752_v49, 1  ;;  %v642_v25 = vperm.slane %v2752_v49, 0  ;;  %vm682_vm8 = vcmp.lt.s32.totalorder %v2687_v26, 113 }
  0x20   : > { %v2812_v37 = vor.u32 %v2219_v63, %v2218_v62  ;;  %v697_v38 = vperm.slane %v2780_v61, 1  ;;  %vm736_vm9 = vcmp.lt.s32.totalorder %v2687_v26, 112  ;;  %v2221_v43 = vld [vmem:[%s3456_s3 + $0x40] ss:$8 sm:$0xf0]  ;;  %vm1008_vm11 = vcmask 1044480  }
  0x21   : > { %518 = vrot.lane.b32.xlu2 %v2523_v1, %s2423_s29  ;;  %504 = vrot.lane.b32.xlu1 %v2529_v3, %s2423_s29  ;;  %vm790_vm12 = vcmp.lt.s32.totalorder %v2687_v26, 111  ;;  %vm1017_vm13 = vcmask 1045504   ;;  %vm1026_vm14 = vcmask 1046528   ;;  %vm1040_vm15 = vcmask 72704   ;;  %s2252_s21 = sshll.u32 %s3474_s13, 5 }
  0x22   : > { %452 = vrot.lane.b32.xlu0 %v2526_v2, %s2422_s28  ;;  %v750_v63 = vperm.slane %v2812_v37, 0 }
  0x29   : > { %409 = vrot.lane.b32.xlu2 %v2523_v1, %s2424_s10  ;;  %397 = vrot.lane.b32.xlu1 %v2526_v2, %s2424_s10 }
  0x2a   : > { %395 = vrot.lane.b32.xlu0 %v2529_v3, %s2424_s10 }
  0x31   : > { %572 = vrot.lane.b32.xlu2 %v2523_v1, %s2425_s11  ;;  %560 = vrot.lane.b32.xlu1 %v2526_v2, %s2425_s11 }
  0x32   : > { %558 = vrot.lane.b32.xlu0 %v2529_v3, %s2425_s11 }
  0x39   : > { %616 = vrot.lane.b32.xlu2 %v2556_v4, %s2426_s12  ;;  %614 = vrot.lane.b32.xlu1 %v2526_v2, %s2426_s12 }
  0x3a   : > { %612 = vrot.lane.b32.xlu0 %v2529_v3, %s2426_s12 }
  0x41   : > { %670 = vrot.lane.b32.xlu2 %v2556_v4, %s2427_s14  ;;  %668 = vrot.lane.b32.xlu1 %v2526_v2, %s2427_s14 }
  0x42   : > { %666 = vrot.lane.b32.xlu0 %v2529_v3, %s2427_s14 }
  0x49   : > { %724 = vrot.lane.b32.xlu2 %v2556_v4, %s2428_s15  ;;  %722 = vrot.lane.b32.xlu1 %v2526_v2, %s2428_s15 }
  0x4a   : > { %720 = vrot.lane.b32.xlu0 %v2529_v3, %s2428_s15 }
  0x51   : > { %778 = vrot.lane.b32.xlu2 %v2556_v4, %s2429_s16  ;;  %776 = vrot.lane.b32.xlu1 %v2526_v2, %s2429_s16 }
  0x52   : > { %774 = vrot.lane.b32.xlu0 %v2529_v3, %s2429_s16 }
  0x59   : > { %508 = vrot.lane.b32.xlu2 %v2556_v4, %s2423_s29  ;;  %456 = vrot.lane.b32.xlu1 %v2583_v5, %s2422_s28 }
  0x5a   : > { %454 = vrot.lane.b32.xlu0 %v2556_v4, %s2422_s28 }
  0x61   : > { %401 = vrot.lane.b32.xlu2 %v2583_v5, %s2424_s10  ;;  %399 = vrot.lane.b32.xlu1 %v2556_v4, %s2424_s10 }
  0x62   : > { %510 = vrot.lane.b32.xlu0 %v2583_v5, %s2423_s29 }
  0x69   : > { %618 = vrot.lane.b32.xlu2 %v2583_v5, %s2426_s12  ;;  %564 = vrot.lane.b32.xlu1 %v2583_v5, %s2425_s11 }
  0x6a   : > { %562 = vrot.lane.b32.xlu0 %v2556_v4, %s2425_s11 }
  0x71   : > { %674 = vrot.lane.b32.xlu2 %v2604_v6, %s2427_s14  ;;  %672 = vrot.lane.b32.xlu1 %v2583_v5, %s2427_s14 }
  0x72   : > { %620 = vrot.lane.b32.xlu0 %v2604_v6, %s2426_s12 }
  0x73   : > { %v2612_v7 = vpop.permute.xlu2 %506 }
  0x79   : > { %780 = vrot.lane.b32.xlu2 %v2583_v5, %s2429_s16  ;;  %728 = vrot.lane.b32.xlu1 %v2604_v6, %s2428_s15 }
  0x7a   : > { %726 = vrot.lane.b32.xlu0 %v2583_v5, %s2428_s15 }
  0x7b   : > { %v2620_v8 = vpop.permute.xlu2 %518 }
  0x81   : > { %460 = vrot.lane.b32.xlu2 %v2623_v9, %s2422_s28  ;;  %458 = vrot.lane.b32.xlu1 %v2604_v6, %s2422_s28 }
  0x82   : > { %782 = vrot.lane.b32.xlu0 %v2604_v6, %s2429_s16 }
  0x83   : > { %v2631_v10 = vpop.permute.xlu2 %409 }
  0x89   : > { %403 = vrot.lane.b32.xlu2 %v2604_v6, %s2424_s10  ;;  %514 = vrot.lane.b32.xlu1 %v2623_v9, %s2423_s29 }
  0x8a   : > { %512 = vrot.lane.b32.xlu0 %v2604_v6, %s2423_s29 }
  0x8b   : > { %v2639_v11 = vpop.permute.xlu1 %464  ;;  %v2641_v12 = vpop.permute.xlu2 %572 }
  0x8c   : > { %v2643_v13 = vpop.permute.xlu0 %450 }
  0x8d   : > { %v474_v40 = vsel %vm466_vm0, %v2639_v11, %v2643_v13 }
  0x8e   : > { %v2750_v48 = vmul.f32 %v480_v39, %v474_v40  ;;  %v696_v39 = vperm.slane %v2780_v61, 0 }
  0x90   : > { %v836_v0 = vrot.slane %v2750_v48, 7 }
  0x91   : > { %568 = vrot.lane.b32.xlu2 %v2623_v9, %s2425_s11  ;;  %566 = vrot.lane.b32.xlu1 %v2604_v6, %s2425_s11 }
  0x92   : > { %405 = vrot.lane.b32.xlu0 %v2623_v9, %s2424_s10 }
  0x93   : > { %v2651_v14 = vpop.permute.xlu2 %616  ;;  %v2653_v15 = vpop.permute.xlu1 %504 }
  0x94   : > { %v2655_v16 = vpop.permute.xlu0 %452  ;;  %v527_v56 = vsel %vm520_vm1, %v2653_v15, %v2612_v7 }
  0x95   : > { %v473_v60 = vsel %vm466_vm0, %v2643_v13, %v2655_v16  ;;  %v528_v13 = vsel %vm520_vm1, %v2620_v8, %v2653_v15  ;;  %v551_v27 = vmul.f32 %v535_v46, %v527_v56 }
  0x96   : > { %v497_v33 = vmul.f32 %v481_v47, %v473_v60 }
  0x97   : > { %v861_v46 = vrot.slane %v551_v27, 6 }
  0x99   : > { %676 = vrot.lane.b32.xlu2 %v2623_v9, %s2427_s14  ;;  %624 = vrot.lane.b32.xlu1 %v2658_v17, %s2426_s12 }
  0x9a   : > { %622 = vrot.lane.b32.xlu0 %v2623_v9, %s2426_s12 }
  0x9b   : > { %v2666_v18 = vpop.permute.xlu2 %670  ;;  %v2668_v19 = vpop.permute.xlu1 %397 }
  0x9c   : > { %v2670_v20 = vpop.permute.xlu0 %395 }
  0x9d   : > { %v420_v29 = vsel %vm413_vm2, %v2670_v20, %v2668_v19  ;;  %v421_v34 = vsel %vm413_vm2, %v2631_v10, %v2670_v20  ;;  %v550_v20 = vmul.f32 %v534_v45, %v528_v13 }
  0x9e   : > { %v443_v40 = vmul.f32 %v427_v53, %v420_v29  ;;  %v442_v47 = vmul.f32 %v426_v52, %v421_v34  ;;  %v837_v53 = vrot.slane %v497_v33, 7  ;;  %v751_v52 = vperm.slane %v2812_v37, 1 }
  0xa0   : > { %v973_v33 = vsel %vm972_vm3, %v442_v47, %v836_v0 }
  0xa1   : > { %732 = vrot.lane.b32.xlu2 %v2658_v17, %s2428_s15  ;;  %730 = vrot.lane.b32.xlu1 %v2623_v9, %s2428_s15 }
  0xa2   : > { %678 = vrot.lane.b32.xlu0 %v2658_v17, %s2427_s14 }
  0xa3   : > { %v2678_v22 = vpop.permute.xlu2 %724  ;;  %v2680_v23 = vpop.permute.xlu1 %560 }
  0xa4   : > { %v2682_v24 = vpop.permute.xlu0 %558 }
  0xa5   : > { %v581_v30 = vsel %vm574_vm4, %v2682_v24, %v2680_v23  ;;  %v582_v15 = vsel %vm574_vm4, %v2641_v12, %v2682_v24  ;;  %v2220_v24 = vld [vmem:[%s3456_s3 + $0x40] ss:$8 sm:$0xf] }
  0xa6   : > { %v605_v42 = vmul.f32 %v589_v58, %v581_v30  ;;  %v604_v48 = vmul.f32 %v588_v57, %v582_v15  ;;  %v2853_v13 = vor.u32 %v2221_v43, %v2220_v24 }
  0xa8   : > { %v885_v27 = vrot.slane %v605_v42, 5  ;;  %v884_v34 = vrot.slane %v604_v48, 5  ;;  %v804_v0 = vperm.slane %v2853_v13, 0 }
  0xa9   : > { %462 = vrot.lane.b32.xlu2 %v2658_v17, %s2422_s28  ;;  %786 = vrot.lane.b32.xlu1 %v2658_v17, %s2429_s16  ;;  %s2433_s28 = smov 119  }
  0xaa   : > { %784 = vrot.lane.b32.xlu0 %v2623_v9, %s2429_s16 }
  0xab   : > { %v2707_v31 = vpop.permute.xlu2 %778  ;;  %v2709_v32 = vpop.permute.xlu1 %614 }
  0xac   : > { %v2717_v35 = vpop.permute.xlu0 %612  ;;  %v634_v45 = vsel %vm628_vm6, %v2709_v32, %v2651_v14 }
  0xad   : > { %3468 = vst [vmem:[#allocation9_spill] sm:$0xff] %v2717_v35  ;;  %v635_v56 = vsel %vm628_vm6, %v2717_v35, %v2709_v32  ;;  %v974_v32 = vsel %vm972_vm3, %v443_v40, %v837_v53  ;;  %v659_v29 = vmul.f32 %v643_v21, %v634_v45  ;;  %v805_v21 = vperm.slane %v2853_v13, 1 }
  0xae   : > { %v983_v24 = vsel %vm981_vm5, %v974_v32, %v861_v46 }
  0xaf   : > { %v992_v42 = vsel %vm990_vm7, %v983_v24, %v885_v27  ;;  %v909_v45 = vrot.slane %v659_v29, 3  ;;  %v2904_v24 = vld [vmem:[#allocation2] sm:$0xff] }
  0xb1   : > { %570 = vrot.lane.b32.xlu2 %v2658_v17, %s2425_s11  ;;  %407 = vrot.lane.b32.xlu1 %v2658_v17, %s2424_s10  ;;  %s2435_s10 = smov 8  }
  0xb2   : > { %516 = vrot.lane.b32.xlu0 %v2658_v17, %s2423_s29  ;;  %v860_v17 = vrot.slane %v550_v20, 6  ;;  %s2434_s29 = smov 7  }
  0xb3   : > { %v2765_v54 = vpop.permute.xlu2 %508  ;;  %v669_v55 = vpop.permute.xlu1 %668 }
  0xb4   : > { %v2774_v59 = vpop.permute.xlu0 %666  ;;  %v688_v58 = vsel %vm682_vm8, %v669_v55, %v2666_v18  ;;  %v982_v40 = vsel %vm981_vm5, %v973_v33, %v860_v17  ;;  %v482_v33 = vperm.slane %v2696_v28, 2 }
  0xb5   : > { %3469 = vst [vmem:[#allocation10_spill] sm:$0xff] %v2774_v59  ;;  %v689_v60 = vsel %vm682_vm8, %v2774_v59, %v669_v55  ;;  %v658_v55 = vmul.f32 %v642_v25, %v635_v56  ;;  %v713_v15 = vmul.f32 %v697_v38, %v688_v58  ;;  %v991_v25 = vsel %vm990_vm7, %v982_v40, %v884_v34 }
  0xb6   : > { %v712_v35 = vmul.f32 %v696_v39, %v689_v60  ;;  %v536_v34 = vperm.slane %v2719_v36, 2  ;;  %v428_v40 = vperm.slane %v2732_v41, 2 }
  0xb7   : > { %v908_v38 = vrot.slane %v658_v55, 3  ;;  %v933_v39 = vrot.slane %v713_v15, 2  ;;  %v526_v15 = vsel %vm520_vm1, %v2612_v7, %v2765_v54 }
  0xb8   : > { %v932_v47 = vrot.slane %v712_v35, 2  ;;  %v1000_v35 = vsel %vm999_vm10, %v991_v25, %v2529_v3 }
  0xb9   : > { %734 = vrot.lane.b32.xlu2 %v2523_v1, %s2428_s15  ;;  %680 = vrot.lane.b32.xlu1 %v2523_v1, %s2427_s14 }
  0xba   : > { %626 = vrot.lane.b32.xlu0 %v2523_v1, %s2426_s12 }
  0xbb   : > { %v2834_v50 = vpop.permute.xlu2 %401  ;;  %v723_v51 = vpop.permute.xlu1 %722 }
  0xbc   : > { %v2844_v57 = vpop.permute.xlu0 %720  ;;  %v742_v62 = vsel %vm736_vm9, %v723_v51, %v2678_v22 }
  0xbd   : > { %v743_v30 = vsel %vm736_vm9, %v2844_v57, %v723_v51  ;;  %v767_v59 = vmul.f32 %v751_v52, %v742_v62  ;;  %v1001_v52 = vsel %vm999_vm10, %v992_v42, %v2526_v2  ;;  %v1009_v62 = vsel %vm1008_vm11, %v1000_v35, %v908_v38 }
  0xbe   : > { %v766_v43 = vmul.f32 %v750_v63, %v743_v30  ;;  %v1018_v32 = vsel %vm1017_vm13, %v1009_v62, %v932_v47 }
  0xbf   : > { %v957_v48 = vrot.slane %v767_v59, 1  ;;  %v1010_v59 = vsel %vm1008_vm11, %v1001_v52, %v909_v45 }
  0xc0   : > { %v956_v53 = vrot.slane %v766_v43, 1  ;;  %v1019_v63 = vsel %vm1017_vm13, %v1010_v59, %v933_v39 }
  0xc1   : > { %v1028_v27 = vsel %vm1026_vm14, %v1019_v63, %v957_v48  ;;  %v483_v63 = vperm.slane %v2696_v28, 3 }
  0xc2   : > { %788 = vrot.lane.b32.xlu0 %v2523_v1, %s2429_s16  ;;  %v1027_v2 = vsel %vm1026_vm14, %v1018_v32, %v956_v53  ;;  %v644_v53 = vperm.slane %v2752_v49, 2  ;;  %s374_s16 = scalar_lea.vmem %s3462_s9, %s2252_s21 }
  0xc3   : > { %v2869_v20 = vpop.permute.xlu2 %618  ;;  %v777_v46 = vpop.permute.xlu1 %776 }
  0xc4   : > { %v796_v17 = vsel %vm790_vm12, %v777_v46, %v2707_v31  ;;  %v2874_v51 = vpop.permute.xlu0 %774 }
  0xc5   : > { %v797_v56 = vsel %vm790_vm12, %v2874_v51, %v777_v46  ;;  %v821_v58 = vmul.f32 %v805_v21, %v796_v17  ;;  %v806_v21 = vperm.slane %v2853_v13, 2 }
  0xc6   : > { %v820_v60 = vmul.f32 %v804_v0, %v797_v56 }
  0xc7   : > { %2224 = vmatpush.msk.msra.mxu3 %vm972_vm3, %v821_v58 }
  0xc8   : > { %2222 = vmatpush.msk.msra.mxu2 %vm972_vm3, %v820_v60 }
  0xc9   : > { %1103 = vmatpush.msra.mxu3 %v1028_v27 }
  0xca   : > { %1083 = vmatpush.msra.mxu2 %v1027_v2  ;;  %2225 = vmatmul.msk.f32.vlgmr.msra.gmra.mxu3 %vm1040_vm15, %v2904_v24 }
  0xcb   : > { %v2891_v29 = vpop.permute.xlu2 %674  ;;  %v2893_v3 = vpop.permute.xlu1 %456  ;;  %2223 = vmatmul.msk.f32.vlgmr.msra.gmra.mxu2 %vm1040_vm15, %v2904_v24 }
  0xcc   : > { %v455_v30 = vpop.permute.xlu0 %454 }
  0xcd   : > { %v472_v55 = vsel %vm466_vm0, %v2655_v16, %v455_v30  ;;  %v552_v16 = vmul.f32 %v536_v34, %v526_v15  ;;  %v471_v27 = vsel %vm466_vm0, %v455_v30, %v2893_v3  ;;  %v591_v34 = vperm.slane %v2740_v44, 3 }
  0xce   : > { %v498_v43 = vmul.f32 %v482_v33, %v472_v55  ;;  %v429_v33 = vperm.slane %v2732_v41, 3 }
  0xcf   : > { %v862_v47 = vrot.slane %v552_v16, 6 }
  0xd0   : > { %v838_v38 = vrot.slane %v498_v43, 7 }
  0xd3   : > { %v2912_v42 = vpop.permute.xlu2 %780  ;;  %v400_v45 = vpop.permute.xlu1 %399 }
  0xd4   : > { %v795_v7 = vsel %vm790_vm12, %v2707_v31, %v2912_v42  ;;  %v419_v0 = vsel %vm413_vm2, %v2668_v19, %v400_v45  ;;  %v2921_v25 = vpop.permute.xlu0 %510  ;;  %v590_v31 = vperm.slane %v2740_v44, 2  ;;  %v633_v19 = vsel %vm628_vm6, %v2651_v14, %v2869_v20 }
  0xd5   : > { %v822_v39 = vmul.f32 %v806_v21, %v795_v7  ;;  %v444_v46 = vmul.f32 %v428_v40, %v419_v0  ;;  %v660_v60 = vmul.f32 %v644_v53, %v633_v19  ;;  %v418_v43 = vsel %vm413_vm2, %v400_v45, %v2834_v50 }
  0xd6   : > { %v525_v30 = vsel %vm520_vm1, %v2765_v54, %v2921_v25  ;;  %v698_v21 = vperm.slane %v2780_v61, 2  ;;  %v499_v40 = vmul.f32 %v483_v63, %v471_v27  ;;  %v445_v0 = vmul.f32 %v429_v33, %v418_v43  ;;  %v377_v63 = vld [vmem:[%s3455_s2] sm:$0xff] }
  0xd7   : > { %v975_v48 = vsel %vm972_vm3, %v444_v46, %v838_v38  ;;  %2226 = vmatpush.msk.msrb.mxu2 %vm972_vm3, %v822_v39  ;;  %v910_v62 = vrot.slane %v660_v60, 3  ;;  %v645_v46 = vperm.slane %v2752_v49, 3  ;;  %v2430_v60 = vmov 0  }
  0xd8   : > { %v984_v17 = vsel %vm981_vm5, %v975_v48, %v862_v47  ;;  %v839_v54 = vrot.slane %v499_v40, 7  ;;  %v752_v48 = vperm.slane %v2812_v37, 2  ;;  %2299 = vset.pattern.permute.xlu1 %v2430_v60  ;;  %2341 = vset.pattern.permute.xlu0 %v2430_v60  ;;  %v807_v40 = vperm.slane %v2853_v13, 3 }
  0xd9   : > { %2340 = vset.pattern.permute.xlu2 %v2430_v60  ;;  %1037 = vperm.xlu1 %2299, %v377_v63   ;;  %v592_v63 = vperm.slane %v2740_v44, 4 }
  0xdb   : > { %v2932_v56 = vpop.permute.xlu1 %564  ;;  %v2964_v7 = vpop.permute.xlu2 %460 }
  0xdc   : > { %v563_v58 = vpop.permute.xlu0 %562 }
  0xdd   : > { %v580_v52 = vsel %vm574_vm4, %v2680_v23, %v563_v58  ;;  %v537_v23 = vperm.slane %v2719_v36, 3 }
  0xde   : > { %v606_v35 = vmul.f32 %v590_v31, %v580_v52 }
  0xdf   : > { %v553_v45 = vmul.f32 %v537_v23, %v525_v30  ;;  %v484_v23 = vperm.slane %v2696_v28, 4 }
  0xe0   : > { %v886_v59 = vrot.slane %v606_v35, 5 }
  0xe1   : > { %v863_v31 = vrot.slane %v553_v45, 6 }
  0xe2   : > { %v993_v32 = vsel %vm990_vm7, %v984_v17, %v886_v59  ;;  %v699_v17 = vperm.slane %v2780_v61, 3 }
  0xe3   : > { %v673_v14 = vpop.permute.xlu1 %672  ;;  %v1002_v2 = vsel %vm999_vm10, %v993_v32, %v2556_v4  ;;  %v579_v4 = vsel %vm574_vm4, %v563_v58, %v2932_v56  ;;  %v753_v58 = vperm.slane %v2812_v37, 3 }
  0xe4   : > { %v2947_v55 = vpop.permute.xlu0 %620  ;;  %v1011_v15 = vsel %vm1008_vm11, %v1002_v2, %v910_v62  ;;  %v687_v16 = vsel %vm682_vm8, %v2666_v18, %v673_v14  ;;  %v607_v38 = vmul.f32 %v591_v34, %v579_v4  ;;  %v976_v18 = vsel %vm972_vm3, %v445_v0, %v839_v54 }
  0xe5   : > { %v714_v39 = vmul.f32 %v698_v21, %v687_v16  ;;  %v632_v47 = vsel %vm628_vm6, %v2869_v20, %v2947_v55  ;;  %v686_v20 = vsel %vm682_vm8, %v673_v14, %v2891_v29  ;;  %v985_v2 = vsel %vm981_vm5, %v976_v18, %v863_v31 }
  0xe6   : > { %v887_v19 = vrot.slane %v607_v38, 5  ;;  %v661_v59 = vmul.f32 %v645_v46, %v632_v47  ;;  %v715_v14 = vmul.f32 %v699_v17, %v686_v20  ;;  %v430_v16 = vperm.slane %v2732_v41, 4 }
  0xe7   : > { %v934_v35 = vrot.slane %v714_v39, 2 }
  0xe8   : > { %v994_v34 = vsel %vm990_vm7, %v985_v2, %v887_v19  ;;  %v911_v43 = vrot.slane %v661_v59, 3  ;;  %v935_v38 = vrot.slane %v715_v14, 2 }
  0xe9   : > { %v1020_v4 = vsel %vm1017_vm13, %v1011_v15, %v934_v35  ;;  %v1003_v15 = vsel %vm999_vm10, %v994_v34, %v2583_v5  ;;  %v700_v34 = vperm.slane %v2780_v61, 4 }
  0xeb   : > { %v2973_v53 = vpop.permute.xlu1 %728 }
  0xec   : > { %v727_v52 = vpop.permute.xlu0 %726 }
  0xed   : > { %v741_v62 = vsel %vm736_vm9, %v2678_v22, %v727_v52  ;;  %v740_v32 = vsel %vm736_vm9, %v727_v52, %v2973_v53  ;;  %v404_v22 = vpop.permute.xlu2 %403 }
  0xee   : > { %v768_v27 = vmul.f32 %v752_v48, %v741_v62  ;;  %v769_v30 = vmul.f32 %v753_v58, %v740_v32  ;;  %v417_v45 = vsel %vm413_vm2, %v2834_v50, %v404_v22  ;;  %v1012_v48 = vsel %vm1008_vm11, %v1003_v15, %v911_v43 }
  0xef   : > { %v446_v18 = vmul.f32 %v430_v16, %v417_v45  ;;  %v1021_v31 = vsel %vm1017_vm13, %v1012_v48, %v935_v38  ;;  %v538_v58 = vperm.slane %v2719_v36, 4 }
  0xf0   : > { %v958_v33 = vrot.slane %v768_v27, 1  ;;  %v959_v54 = vrot.slane %v769_v30, 1 }
  0xf2   : > { %v1029_v21 = vsel %vm1026_vm14, %v1020_v4, %v958_v33  ;;  %v1030_v19 = vsel %vm1026_vm14, %v1021_v31, %v959_v54  ;;  %v431_v4 = vperm.slane %v2732_v41, 5  ;;  %v647_v31 = vperm.slane %v2752_v49, 5 }
  0xf3   : > { %1123 = vmatpush.msrb.mxu2 %v1029_v21  ;;  %v459_v0 = vpop.permute.xlu1 %458  ;;  %v539_v21 = vperm.slane %v2719_v36, 5 }
  0xf4   : > { %v470_v39 = vsel %vm466_vm0, %v2893_v3, %v459_v0  ;;  %v3002_v46 = vpop.permute.xlu0 %782  ;;  %2227 = vmatmul.msk.f32.vlgmr.msrb.gmra.mxu2 %vm1040_vm15, %v2904_v24 }
  0xf5   : > { %v500_v47 = vmul.f32 %v484_v23, %v470_v39  ;;  %v794_v50 = vsel %vm790_vm12, %v2912_v42, %v3002_v46  ;;  %v3018_v52 = vpop.permute.xlu2 %568  ;;  %v485_v23 = vperm.slane %v2696_v28, 5 }
  0xf6   : > { %v823_v17 = vmul.f32 %v807_v40, %v794_v50 }
  0xf7   : > { %v840_v3 = vrot.slane %v500_v47, 7 }
  0xf8   : > { %2228 = vmatpush.msk.msrb.mxu3 %vm972_vm3, %v823_v17 }
  0xf9   : > { %v977_v5 = vsel %vm972_vm3, %v446_v18, %v840_v3 }
  0xfa   : > { %1143 = vmatpush.msrb.mxu3 %v1030_v19 }
  0xfb   : > { %2229 = vmatmul.msk.f32.vlgmr.msrb.gmra.mxu3 %vm1040_vm15, %v2904_v24  ;;  %v3022_v42 = vpop.permute.xlu1 %514 }
  0xfc   : > { %v513_v60 = vpop.permute.xlu0 %512 }
  0xfd   : > { %v524_v20 = vsel %vm520_vm1, %v2921_v25, %v513_v60  ;;  %v677_v14 = vpop.permute.xlu2 %676  ;;  %v469_v25 = vsel %vm466_vm0, %v459_v0, %v2964_v7  ;;  %v523_v0 = vsel %vm520_vm1, %v513_v60, %v3022_v42 }
  0xfe   : > { %v554_v35 = vmul.f32 %v538_v58, %v524_v20  ;;  %v685_v43 = vsel %vm682_vm8, %v2891_v29, %v677_v14  ;;  %v501_v45 = vmul.f32 %v485_v23, %v469_v25  ;;  %v593_v29 = vperm.slane %v2740_v44, 5 }
  0xff   : > { %v716_v39 = vmul.f32 %v700_v34, %v685_v43  ;;  %v555_v17 = vmul.f32 %v539_v21, %v523_v0  ;;  %v754_v34 = vperm.slane %v2812_v37, 4 }
 0x100   : > { %v864_v59 = vrot.slane %v554_v35, 6  ;;  %v841_v18 = vrot.slane %v501_v45, 7 }
 0x101   : > { %v936_v19 = vrot.slane %v716_v39, 2  ;;  %v865_v35 = vrot.slane %v555_v17, 6  ;;  %v809_v39 = vperm.slane %v2853_v13, 5 }
 0x102   : > { %v986_v62 = vsel %vm981_vm5, %v977_v5, %v864_v59 }
 0x103   : > { %v567_v32 = vpop.permute.xlu1 %566 }
 0x104   : > { %v578_v27 = vsel %vm574_vm4, %v2932_v56, %v567_v32  ;;  %v3032_v2 = vpop.permute.xlu0 %405  ;;  %v646_v56 = vperm.slane %v2752_v49, 4  ;;  %v577_v15 = vsel %vm574_vm4, %v567_v32, %v3018_v52 }
 0x105   : > { %v608_v33 = vmul.f32 %v592_v63, %v578_v27  ;;  %v416_v40 = vsel %vm413_vm2, %v404_v22, %v3032_v2  ;;  %v3061_v48 = vpop.permute.xlu2 %732  ;;  %v609_v3 = vmul.f32 %v593_v29, %v577_v15  ;;  %v701_v27 = vperm.slane %v2780_v61, 5 }
 0x106   : > { %v447_v47 = vmul.f32 %v431_v4, %v416_v40 }
 0x107   : > { %v888_v30 = vrot.slane %v608_v33, 5  ;;  %v889_v63 = vrot.slane %v609_v3, 5 }
 0x108   : > { %v978_v60 = vsel %vm972_vm3, %v447_v47, %v841_v18 }
 0x109   : > { %v995_v22 = vsel %vm990_vm7, %v986_v62, %v888_v30  ;;  %v987_v23 = vsel %vm981_vm5, %v978_v60, %v865_v35  ;;  %v432_v60 = vperm.slane %v2732_v41, 6 }
 0x10a   : > { %v996_v21 = vsel %vm990_vm7, %v987_v23, %v889_v63  ;;  %v594_v63 = vperm.slane %v2740_v44, 6 }
 0x10b   : > { %v3048_v16 = vpop.permute.xlu1 %624 }
 0x10c   : > { %v623_v38 = vpop.permute.xlu0 %622 }
 0x10d   : > { %v631_v54 = vsel %vm628_vm6, %v2947_v55, %v623_v38  ;;  %v630_v58 = vsel %vm628_vm6, %v623_v38, %v3048_v16  ;;  %v1004_v55 = vsel %vm999_vm10, %v995_v22, %v2604_v6  ;;  %v755_v6 = vperm.slane %v2812_v37, 5  ;;  %v463_v40 = vpop.permute.xlu2 %462 }
 0x10e   : > { %v662_v50 = vmul.f32 %v646_v56, %v631_v54  ;;  %v663_v32 = vmul.f32 %v647_v31, %v630_v58  ;;  %v808_v38 = vperm.slane %v2853_v13, 4  ;;  %v468_v58 = vsel %vm466_vm0, %v2964_v7, %v463_v40 }
 0x110   : > { %v912_v5 = vrot.slane %v662_v50, 3  ;;  %v913_v4 = vrot.slane %v663_v32, 3 }
 0x112   : > { %v1013_v20 = vsel %vm1008_vm11, %v1004_v55, %v912_v5  ;;  %v486_v5 = vperm.slane %v2696_v28, 6 }
 0x113   : > { %v731_v59 = vpop.permute.xlu1 %730  ;;  %v1022_v62 = vsel %vm1017_vm13, %v1013_v20, %v936_v19  ;;  %v467_v19 = vsel %vm466_vm0, %v463_v40, %v2639_v11  ;;  %v540_v11 = vperm.slane %v2719_v36, 6  ;;  %v541_v20 = vperm.slane %v2719_v36, 7 }
 0x114   : > { %v3073_v33 = vpop.permute.xlu0 %678  ;;  %v738_v25 = vsel %vm736_vm9, %v731_v59, %v3061_v48  ;;  %v739_v43 = vsel %vm736_vm9, %v2973_v53, %v731_v59  ;;  %v1005_v53 = vsel %vm999_vm10, %v996_v21, %v2623_v9  ;;  %v487_v9 = vperm.slane %v2696_v28, 7 }
 0x115   : > { %v684_v30 = vsel %vm682_vm8, %v677_v14, %v3073_v33  ;;  %v770_v45 = vmul.f32 %v754_v34, %v739_v43  ;;  %v771_v0 = vmul.f32 %v755_v6, %v738_v25  ;;  %v1014_v14 = vsel %vm1008_vm11, %v1005_v53, %v913_v4  ;;  %v571_v59 = vpop.permute.xlu2 %570 }
 0x116   : > { %v717_v56 = vmul.f32 %v701_v27, %v684_v30  ;;  %v433_v28 = vperm.slane %v2732_v41, 7  ;;  %v502_v35 = vmul.f32 %v486_v5, %v468_v58  ;;  %v503_v7 = vmul.f32 %v487_v9, %v467_v19 }
 0x117   : > { %v960_v22 = vrot.slane %v770_v45, 1  ;;  %v961_v47 = vrot.slane %v771_v0, 1  ;;  %v595_v41 = vperm.slane %v2740_v44, 7  ;;  %v575_v44 = vsel %vm574_vm4, %v571_v59, %v2641_v12 }
 0x118   : > { %v937_v29 = vrot.slane %v717_v56, 2  ;;  %v842_v30 = vrot.slane %v502_v35, 7  ;;  %v843_v4 = vrot.slane %v503_v7, 7  ;;  %v702_v0 = vperm.slane %v2780_v61, 6 }
 0x119   : > { %v703_v12 = vperm.slane %v2780_v61, 7  ;;  %v756_v19 = vperm.slane %v2812_v37, 6  ;;  %v757_v58 = vperm.slane %v2812_v37, 7  ;;  %v811_v35 = vperm.slane %v2853_v13, 7 }
 0x11a   : > { %v1023_v31 = vsel %vm1017_vm13, %v1014_v14, %v937_v29  ;;  %v648_v29 = vperm.slane %v2752_v49, 6  ;;  %v3470_v14 = vld [vmem:[#allocation10_spill] sm:$0xff]  ;;  %vm2001_vm0 = vcmp.lt.s32.totalorder %v2687_v26, 119 }
 0x11b   : > { %v3090_v15 = vpop.permute.xlu1 %786  ;;  %v1032_v55 = vsel %vm1026_vm14, %v1023_v31, %v961_v47 }
 0x11c   : > { %v785_v54 = vpop.permute.xlu0 %784 }
 0x11d   : > { %v792_v50 = vsel %vm790_vm12, %v785_v54, %v3090_v15  ;;  %v793_v17 = vsel %vm790_vm12, %v3002_v46, %v785_v54  ;;  %v1031_v46 = vsel %vm1026_vm14, %v1022_v62, %v960_v22 }
 0x11e   : > { %v824_v18 = vmul.f32 %v808_v38, %v793_v17  ;;  %v825_v3 = vmul.f32 %v809_v39, %v792_v50  ;;  %v735_v17 = vpop.permute.xlu2 %734 }
 0x120   : > { %2230 = vmatpush.msk.msra.mxu2 %vm972_vm3, %v824_v18  ;;  %2232 = vmatpush.msk.msra.mxu3 %vm972_vm3, %v825_v3  ;;  %v3471_v18 = vld [vmem:[#allocation9_spill] sm:$0xff] }
 0x122   : > { %1163 = vmatpush.msra.mxu2 %v1031_v46  ;;  %1183 = vmatpush.msra.mxu3 %v1032_v55 }
 0x123   : > { %2231 = vmatmul.msk.f32.vlgmr.msra.gmra.mxu2 %vm1040_vm15, %v2904_v24  ;;  %2233 = vmatmul.msk.f32.vlgmr.msra.gmra.mxu3 %vm1040_vm15, %v2904_v24  ;;  %v408_v62 = vpop.permute.xlu1 %407 }
 0x124   : > { %v414_v32 = vsel %vm413_vm2, %v408_v62, %v2631_v10  ;;  %v415_v36 = vsel %vm413_vm2, %v3032_v2, %v408_v62  ;;  %v517_v27 = vpop.permute.xlu0 %516  ;;  %v576_v10 = vsel %vm574_vm4, %v3018_v52, %v571_v59  ;;  %v649_v52 = vperm.slane %v2752_v49, 7  ;;  %v3472_v59 = vld [vmem:[#allocation8_spill] sm:$0xff] }
 0x125   : > { %v448_v23 = vmul.f32 %v432_v60, %v415_v36  ;;  %v449_v34 = vmul.f32 %v433_v28, %v414_v32  ;;  %v521_v6 = vsel %vm520_vm1, %v517_v27, %v2620_v8  ;;  %v522_v25 = vsel %vm520_vm1, %v3022_v42, %v517_v27 }
 0x126   : > { %v556_v2 = vmul.f32 %v540_v11, %v522_v25  ;;  %v557_v43 = vmul.f32 %v541_v20, %v521_v6  ;;  %v610_v40 = vmul.f32 %v594_v63, %v576_v10  ;;  %v611_v8 = vmul.f32 %v595_v41, %v575_v44 }
 0x127   : > { %v979_v45 = vsel %vm972_vm3, %v448_v23, %v842_v30  ;;  %v980_v42 = vsel %vm972_vm3, %v449_v34, %v843_v4  ;;  %v744_v60 = vsel %vm736_vm9, %v735_v17, %v2844_v57  ;;  %v810_v20 = vperm.slane %v2853_v13, 6 }
 0x128   : > { %v866_v56 = vrot.slane %v556_v2, 6  ;;  %v867_v21 = vrot.slane %v557_v43, 6  ;;  %v890_v50 = vrot.slane %v610_v40, 5  ;;  %v891_v61 = vrot.slane %v611_v8, 5 }
 0x129   : > { %vm1969_vm1 = vcmp.lt.s32.totalorder %v2687_v26, 121  ;;  %vm1985_vm2 = vcmp.lt.s32.totalorder %v2687_v26, 120 }
 0x12a   : > { %v988_v39 = vsel %vm981_vm5, %v979_v45, %v866_v56  ;;  %v989_v53 = vsel %vm981_vm5, %v980_v42, %v867_v21  ;;  %vm1907_vm5 = vcmp.lt.s32.totalorder %v2687_v26, 8 }
 0x12b   : > { %v681_v38 = vpop.permute.xlu1 %680  ;;  %v997_v46 = vsel %vm990_vm7, %v988_v39, %v890_v50  ;;  %v998_v55 = vsel %vm990_vm7, %v989_v53, %v891_v61 }
 0x12c   : > { %v683_v54 = vsel %vm682_vm8, %v3073_v33, %v681_v38  ;;  %v690_v22 = vsel %vm682_vm8, %v681_v38, %v3470_v14  ;;  %v627_v47 = vpop.permute.xlu0 %626  ;;  %v1006_v62 = vsel %vm999_vm10, %v997_v46, %v3472_v59  ;;  %v1007_v63 = vsel %vm999_vm10, %v998_v55, %v2523_v1  ;;  %v1400_v46 = vld [vmem:[#allocation4 + $0x2e0] sm:$0xff]  ;;  %v1330_v59 = vld [vmem:[#allocation4 + $0xb0] sm:$0xff] }
 0x12d   : > { %v629_v49 = vsel %vm628_vm6, %v3048_v16, %v627_v47  ;;  %v636_v3 = vsel %vm628_vm6, %v627_v47, %v3471_v18  ;;  %v718_v31 = vmul.f32 %v702_v0, %v683_v54  ;;  %v719_v5 = vmul.f32 %v703_v12, %v690_v22  ;;  %v1432_v55 = vld [vmem:[#allocation4 + $0x3e0] sm:$0xff] }
 0x12e   : > { %v664_v9 = vmul.f32 %v648_v29, %v629_v49  ;;  %v665_v33 = vmul.f32 %v649_v52, %v636_v3  ;;  %v737_v16 = vsel %vm736_vm9, %v3061_v48, %v735_v17  ;;  %v773_v48 = vmul.f32 %v757_v58, %v744_v60  ;;  %v1368_v58 = vld [vmem:[#allocation4 + $0x1e0] sm:$0xff]  ;;  %v1366_v60 = vld [vmem:[#allocation4 + $0x1d0] sm:$0xff] }
 0x12f   : > { %v938_v7 = vrot.slane %v718_v31, 2  ;;  %v939_v37 = vrot.slane %v719_v5, 2  ;;  %v772_v41 = vmul.f32 %v756_v19, %v737_v16  ;;  %v1338_v31 = vld [vmem:[#allocation4 + $0xf0] sm:$0xff]  ;;  %v1336_v19 = vld [vmem:[#allocation4 + $0xe0] sm:$0xff] }
 0x130   : > { %v914_v28 = vrot.slane %v664_v9, 3  ;;  %v915_v11 = vrot.slane %v665_v33, 3  ;;  %v963_v44 = vrot.slane %v773_v48, 1  ;;  %v1370_v5 = vld [vmem:[#allocation4 + $0x1f0] sm:$0xff]  ;;  %1564 = vmatpush.msra.mxu0 %v1338_v31 }
 0x131   : > { %v962_v25 = vrot.slane %v772_v41, 1  ;;  %v1402_v9 = vld [vmem:[#allocation4 + $0x2f0] sm:$0xff]  ;;  %1584 = vmatpush.msra.mxu1 %v1370_v5 }
 0x132   : > { %v1015_v32 = vsel %vm1008_vm11, %v1006_v62, %v914_v28  ;;  %v1016_v57 = vsel %vm1008_vm11, %v1007_v63, %v915_v11  ;;  %v1434_v33 = vld [vmem:[#allocation4 + $0x3f0] sm:$0xff]  ;;  %1565 = vmatpush.msra.mxu0 %v1336_v19 }
 0x133   : > { %v1024_v6 = vsel %vm1017_vm13, %v1015_v32, %v938_v7  ;;  %v1025_v1 = vsel %vm1017_vm13, %v1016_v57, %v939_v37  ;;  %v1334_v16 = vld [vmem:[#allocation4 + $0xd0] sm:$0xff]  ;;  %1585 = vmatpush.msra.mxu1 %v1368_v58  ;;  %v1396_v7 = vld [vmem:[#allocation4 + $0x2c0] sm:$0xff] }
 0x134   : > { %v789_v36 = vpop.permute.xlu0 %788  ;;  %v1033_v10 = vsel %vm1026_vm14, %v1024_v6, %v962_v25  ;;  %v1398_v28 = vld [vmem:[#allocation4 + $0x2d0] sm:$0xff]  ;;  %1566 = vmatpush.msra.mxu0 %v1334_v16  ;;  %v1428_v37 = vld [vmem:[#allocation4 + $0x3c0] sm:$0xff] }
 0x135   : > { %v791_v27 = vsel %vm790_vm12, %v3090_v15, %v789_v36  ;;  %v798_v13 = vsel %vm790_vm12, %v789_v36, %v2874_v51  ;;  %v1034_v15 = vsel %vm1026_vm14, %v1025_v1, %v963_v44  ;;  %v1430_v11 = vld [vmem:[#allocation4 + $0x3d0] sm:$0xff]  ;;  %1586 = vmatpush.msra.mxu1 %v1366_v60  ;;  %v1328_v32 = vld [vmem:[#allocation4 + $0xa0] sm:$0xff] }
 0x136   : > { %v826_v23 = vmul.f32 %v810_v20, %v791_v27  ;;  %v827_v34 = vmul.f32 %v811_v35, %v798_v13  ;;  %v1332_v20 = vld [vmem:[#allocation4 + $0xc0] sm:$0xff]  ;;  %v1362_v62 = vld [vmem:[#allocation4 + $0x1b0] sm:$0xff] }
 0x137   : > { %v1364_v35 = vld [vmem:[#allocation4 + $0x1c0] sm:$0xff]  ;;  %1567 = vmatpush.msra.mxu0 %v1332_v20  ;;  %v1394_v41 = vld [vmem:[#allocation4 + $0x2b0] sm:$0xff] }
 0x138   : > { %2234 = vmatpush.msk.msrb.mxu2 %vm972_vm3, %v826_v23  ;;  %2236 = vmatpush.msk.msrb.mxu3 %vm972_vm3, %v827_v34  ;;  %v1426_v48 = vld [vmem:[#allocation4 + $0x3b0] sm:$0xff]  ;;  %v1360_v57 = vld [vmem:[#allocation4 + $0x1a0] sm:$0xff]  ;;  %vm1923_vm3 = vcmp.lt.s32.totalorder %v2687_v26, 7 }
 0x139   : > { %1587 = vmatpush.msra.mxu1 %v1364_v35  ;;  %1568 = vmatpush.msra.mxu0 %v1330_v59  ;;  %v1392_v36 = vld [vmem:[#allocation4 + $0x2a0] sm:$0xff]  ;;  %v1326_v13 = vld [vmem:[#allocation4 + $0x90] sm:$0xff] }
 0x13a   : > { %1203 = vmatpush.msrb.mxu2 %v1033_v10  ;;  %1223 = vmatpush.msrb.mxu3 %v1034_v15  ;;  %v1424_v27 = vld [vmem:[#allocation4 + $0x3a0] sm:$0xff]  ;;  %v1358_v23 = vld [vmem:[#allocation4 + $0x190] sm:$0xff] }
 0x13b   : > { %2235 = vmatmul.msk.f32.vlgmr.msrb.gmra.mxu2 %vm1040_vm15, %v2904_v24  ;;  %2237 = vmatmul.msk.f32.vlgmr.msrb.gmra.mxu3 %vm1040_vm15, %v2904_v24  ;;  %v1390_v1 = vld [vmem:[#allocation4 + $0x290] sm:$0xff]  ;;  %v1324_v44 = vld [vmem:[#allocation4 + $0x80] sm:$0xff] }
 0x13c   : > { %1604 = vmatpush.msra.mxu2 %v1402_v9  ;;  %1624 = vmatpush.msra.mxu3 %v1434_v33  ;;  %v1422_v25 = vld [vmem:[#allocation4 + $0x390] sm:$0xff]  ;;  %v1356_v10 = vld [vmem:[#allocation4 + $0x180] sm:$0xff] }
 0x13d   : > { %1588 = vmatpush.msra.mxu1 %v1362_v62  ;;  %1569 = vmatpush.msra.mxu0 %v1328_v32  ;;  %v1388_v15 = vld [vmem:[#allocation4 + $0x280] sm:$0xff]  ;;  %v1318_v19 = vld [vmem:[#allocation4 + $0x50] sm:$0xff] }
 0x13e   : > { %1605 = vmatpush.msra.mxu2 %v1400_v46  ;;  %1625 = vmatpush.msra.mxu3 %v1432_v55  ;;  %v1350_v58 = vld [vmem:[#allocation4 + $0x150] sm:$0xff]  ;;  %v1348_v35 = vld [vmem:[#allocation4 + $0x140] sm:$0xff] }
 0x13f   : > { %1589 = vmatpush.msra.mxu1 %v1360_v57  ;;  %1570 = vmatpush.msra.mxu0 %v1326_v13  ;;  %v1314_v59 = vld [vmem:[#allocation4 + $0x30] sm:$0xff]  ;;  %v1312_v57 = vld [vmem:[#allocation4 + $0x20] sm:$0xff] }
 0x140   : > { %1606 = vmatpush.msra.mxu2 %v1398_v28  ;;  %1626 = vmatpush.msra.mxu3 %v1430_v11  ;;  %v1382_v28 = vld [vmem:[#allocation4 + $0x250] sm:$0xff]  ;;  %v1408_v13 = vld [vmem:[#allocation4 + $0x320] sm:$0xff] }
 0x141   : > { %1590 = vmatpush.msra.mxu1 %v1358_v23  ;;  %1571 = vmatpush.msra.mxu0 %v1324_v44  ;;  %v1414_v11 = vld [vmem:[#allocation4 + $0x350] sm:$0xff]  ;;  %v1372_v44 = vld [vmem:[#allocation4 + $0x200] sm:$0xff] }
 0x142   : > { %1607 = vmatpush.msra.mxu2 %v1396_v7  ;;  %1627 = vmatpush.msra.mxu3 %v1428_v37  ;;  %v1380_v7 = vld [vmem:[#allocation4 + $0x240] sm:$0xff]  ;;  %v1346_v62 = vld [vmem:[#allocation4 + $0x130] sm:$0xff] }
 0x143   : > { %1591 = vmatpush.msra.mxu1 %v1356_v10  ;;  %v1412_v37 = vld [vmem:[#allocation4 + $0x340] sm:$0xff]  ;;  %v1410_v32 = vld [vmem:[#allocation4 + $0x330] sm:$0xff] }
 0x144   : > { %1608 = vmatpush.msra.mxu2 %v1394_v41  ;;  %1628 = vmatpush.msra.mxu3 %v1426_v48  ;;  %v1310_v23 = vld [vmem:[#allocation4 + $0x10] sm:$0xff]  ;;  %v1404_v10 = vld [vmem:[#allocation4 + $0x300] sm:$0xff] }
 0x146   : > { %1609 = vmatpush.msra.mxu2 %v1392_v36  ;;  %1629 = vmatpush.msra.mxu3 %v1424_v27  ;;  %v1344_v36 = vld [vmem:[#allocation4 + $0x120] sm:$0xff] }
 0x147   : > { %v1376_v27 = vld [vmem:[#allocation4 + $0x220] sm:$0xff] }
 0x148   : > { %1610 = vmatpush.msra.mxu2 %v1390_v1  ;;  %1630 = vmatpush.msra.mxu3 %v1422_v25  ;;  %v1308_v1 = vld [vmem:[#allocation4] sm:$0xff] }
 0x149   : > { %v1340_v25 = vld [vmem:[#allocation4 + $0x100] sm:$0xff] }
 0x14a   : > { %1611 = vmatpush.msra.mxu2 %v1388_v15  ;;  %v1466_v15 = vld [vmem:[#allocation4 + $0x4f0] sm:$0xff] }
 0x14b   : > { %v1038_v43 = vpop.permute.xlu1 %1037 }
 0x14d   : > { %v1105_v2 = vpop.f32.mrf.mxu3 }
 0x14e   : > { %v1085_v51 = vpop.f32.mrf.mxu2  ;;  %v1106_v40 = vadd.f32 %v1105_v2, %v1038_v43  ;;  %v1322_v2 = vld [vmem:[#allocation4 + $0x70] sm:$0xff] }
 0x14f   : > { %v1086_v21 = vadd.f32 %v1085_v51, %v1038_v43  ;;  %v1420_v51 = vld [vmem:[#allocation4 + $0x380] sm:$0xff]  ;;  %1572 = vmatpush.msra.mxu0 %v1322_v2  ;;  %v1530_v2 = vld [vmem:[#allocation4 + $0x6f0] sm:$0xff] }
 0x150   : > { %v3210_v45 = vmax.f32 %v1106_v40, 0.0  ;;  %v1386_v40 = vld [vmem:[#allocation4 + $0x270] sm:$0xff]  ;;  %1631 = vmatpush.msra.mxu3 %v1420_v51 }
 0x151   : > { %v3206_v24 = vmax.f32 %v1086_v21, 0.0  ;;  %1612 = vmatpush.msra.mxu2 %v1386_v40  ;;  %v1498_v51 = vld [vmem:[#allocation4 + $0x5f0] sm:$0xff]  ;;  %v1560_v40 = vld [vmem:[#allocation4 + $0x7e0] sm:$0xff] }
 0x152   : > { %1237 = vst [vmem:[%s3202_s26 + $0x8] sm:$0xff] %v3210_v45 }
 0x153   : > { %1236 = vst [vmem:[%s3202_s26] sm:$0xff] %v3206_v24 }
 0x177   : > { %v1125_v30 = vpop.f32.mrf.mxu2 }
 0x178   : > { %v1126_v4 = vadd.f32 %v1125_v30, %v1038_v43 }
 0x17a   : > { %v3197_v56 = vmax.f32 %v1126_v4, 0.0 }
 0x17c   : > { %1238 = vst [vmem:[%s3202_s26 + $0x10] sm:$0xff] %v3197_v56 }
 0x17e   : > { %v1145_v8 = vpop.f32.mrf.mxu3 }
 0x17f   : > { %v1146_v42 = vadd.f32 %v1145_v8, %v1038_v43  ;;  %v1418_v8 = vld [vmem:[#allocation4 + $0x370] sm:$0xff] }
 0x180   : > { %1632 = vmatpush.msra.mxu3 %v1418_v8  ;;  %v1462_v8 = vld [vmem:[#allocation4 + $0x4d0] sm:$0xff] }
 0x181   : > { %v3214_v0 = vmax.f32 %v1146_v42, 0.0 }
 0x183   : > { %1239 = vst [vmem:[%s3202_s26 + $0x18] sm:$0xff] %v3214_v0  ;;  %v2300_v12 = vpack.i.bf16 %v3214_v0, %v3197_v56 }
 0x185   : > { %2301 = vrot.lane.b32.xlu2 %v2300_v12, %s2426_s12 }
 0x1a6   : > { %v1165_v29 = vpop.f32.mrf.mxu2  ;;  %v1185_v52 = vpop.f32.mrf.mxu3 }
 0x1a7   : > { %v1166_v38 = vadd.f32 %v1165_v29, %v1038_v43  ;;  %v1186_v39 = vadd.f32 %v1185_v52, %v1038_v43 }
 0x1a9   : > { %v3221_v53 = vmax.f32 %v1166_v38, 0.0  ;;  %v3223_v54 = vmax.f32 %v1186_v39, 0.0  ;;  %v1320_v39 = vld [vmem:[#allocation4 + $0x60] sm:$0xff] }
 0x1aa   : > { %1573 = vmatpush.msra.mxu0 %v1320_v39  ;;  %v1524_v39 = vld [vmem:[#allocation4 + $0x6c0] sm:$0xff] }
 0x1ab   : > { %1240 = vst [vmem:[%s3202_s26 + $0x20] sm:$0xff] %v3221_v53  ;;  %v2305_v14 = vpack.i.bf16 %v3206_v24, %v3221_v53  ;;  %v2310_v22 = vpack.i.bf16 %v3223_v54, %v3210_v45 }
 0x1ac   : > { %1241 = vst [vmem:[%s3202_s26 + $0x28] sm:$0xff] %v3223_v54  ;;  %1574 = vmatpush.msra.mxu0 %v1318_v19  ;;  %v1486_v19 = vld [vmem:[#allocation4 + $0x590] sm:$0xff] }
 0x1ad   : > { %2306 = vrot.lane.b32.xlu0 %v2305_v14, %s2426_s12  ;;  %2311 = vrot.lane.b32.xlu1 %v2310_v22, %s2426_s12 }
 0x1be   : > { %v1205_v47 = vpop.f32.mrf.mxu2  ;;  %v1225_v50 = vpop.f32.mrf.mxu3 }
 0x1bf   : > { %v1206_v61 = vadd.f32 %v1205_v47, %v1038_v43  ;;  %v1226_v17 = vadd.f32 %v1225_v50, %v1038_v43  ;;  %v1354_v43 = vld [vmem:[#allocation4 + $0x170] sm:$0xff]  ;;  %v1352_v47 = vld [vmem:[#allocation4 + $0x160] sm:$0xff] }
 0x1c0   : > { %1592 = vmatpush.msra.mxu1 %v1354_v43  ;;  %v1562_v43 = vld [vmem:[#allocation4 + $0x7f0] sm:$0xff] }
 0x1c1   : > { %v3235_v49 = vmax.f32 %v1206_v61, 0.0  ;;  %v3237_v18 = vmax.f32 %v1226_v17, 0.0  ;;  %v1384_v17 = vld [vmem:[#allocation4 + $0x260] sm:$0xff] }
 0x1c2   : > { %1593 = vmatpush.msra.mxu1 %v1352_v47  ;;  %1613 = vmatpush.msra.mxu2 %v1384_v17  ;;  %v1490_v47 = vld [vmem:[#allocation4 + $0x5b0] sm:$0xff]  ;;  %v1456_v17 = vld [vmem:[#allocation4 + $0x4a0] sm:$0xff] }
 0x1c3   : > { %1242 = vst [vmem:[%s3202_s26 + $0x30] sm:$0xff] %v3235_v49  ;;  %v2315_v3 = vpack.i.bf16 %v3237_v18, %v3235_v49 }
 0x1c4   : > { %1243 = vst [vmem:[%s3202_s26 + $0x38] sm:$0xff] %v3237_v18  ;;  %1594 = vmatpush.msra.mxu1 %v1350_v58  ;;  %1614 = vmatpush.msra.mxu2 %v1382_v28  ;;  %v1518_v58 = vld [vmem:[#allocation4 + $0x690] sm:$0xff] }
 0x1c5   : > { %2316 = vrot.lane.b32.xlu2 %v2315_v3, %s2426_s12  ;;  %v1416_v3 = vld [vmem:[#allocation4 + $0x360] sm:$0xff]  ;;  %v1550_v28 = vld [vmem:[#allocation4 + $0x790] sm:$0xff] }
 0x1c6   : > { %1633 = vmatpush.msra.mxu3 %v1416_v3  ;;  %1595 = vmatpush.msra.mxu1 %v1348_v35  ;;  %v1488_v3 = vld [vmem:[#allocation4 + $0x5a0] sm:$0xff]  ;;  %v1546_v35 = vld [vmem:[#allocation4 + $0x770] sm:$0xff] }
 0x1c7   : > { %1615 = vmatpush.msra.mxu2 %v1380_v7  ;;  %v1448_v7 = vld [vmem:[#allocation4 + $0x460] sm:$0xff] }
 0x1c8   : > { %1634 = vmatpush.msra.mxu3 %v1414_v11  ;;  %1596 = vmatpush.msra.mxu1 %v1346_v62  ;;  %v1452_v11 = vld [vmem:[#allocation4 + $0x480] sm:$0xff] }
 0x1c9   : > { %v1544_v62 = vld [vmem:[#allocation4 + $0x760] sm:$0xff] }
 0x1ca   : > { %1635 = vmatpush.msra.mxu3 %v1412_v37  ;;  %1597 = vmatpush.msra.mxu1 %v1344_v36  ;;  %v1480_v37 = vld [vmem:[#allocation4 + $0x560] sm:$0xff]  ;;  %v1542_v36 = vld [vmem:[#allocation4 + $0x750] sm:$0xff] }
 0x1cc   : > { %1636 = vmatpush.msra.mxu3 %v1410_v32  ;;  %v1478_v32 = vld [vmem:[#allocation4 + $0x550] sm:$0xff] }
 0x1ce   : > { %1637 = vmatpush.msra.mxu3 %v1408_v13  ;;  %v1476_v13 = vld [vmem:[#allocation4 + $0x540] sm:$0xff] }
 0x1df   : > { %v3246_v63 = vpop.permute.xlu2 %2301 }
 0x1e0   : > { %v2304_v34 = vunpack.i.h.bf16 %v3246_v63  ;;  %v2303_v6 = vunpack.i.l.bf16 %v3246_v63  ;;  %v1378_v63 = vld [vmem:[#allocation4 + $0x230] sm:$0xff] }
 0x1e1   : > { %1616 = vmatpush.msra.mxu2 %v1378_v63  ;;  %v1446_v63 = vld [vmem:[#allocation4 + $0x450] sm:$0xff] }
 0x1e2   : > { %v1264_v30 = vsel %vm628_vm6, %v2303_v6, %v2304_v34 }
 0x1e3   : > { %v3263_v33 = vmax.f32 %v3197_v56, %v1264_v30  ;;  %1617 = vmatpush.msra.mxu2 %v1376_v27  ;;  %v1464_v30 = vld [vmem:[#allocation4 + $0x4e0] sm:$0xff] }
 0x1e4   : > { %v1444_v27 = vld [vmem:[#allocation4 + $0x440] sm:$0xff] }
 0x21f   : > { %v2312_v4 = vpop.permute.xlu1 %2311  ;;  %v2317_v21 = vpop.permute.xlu2 %2316 }
 0x220   : > { %v2314_v42 = vunpack.i.h.bf16 %v2312_v4  ;;  %v2313_v12 = vunpack.i.l.bf16 %v2312_v4  ;;  %v2319_v29 = vunpack.i.h.bf16 %v2317_v21  ;;  %v2318_v52 = vunpack.i.l.bf16 %v2317_v21  ;;  %v2307_v38 = vpop.permute.xlu0 %2306  ;;  %v1496_v4 = vld [vmem:[#allocation4 + $0x5e0] sm:$0xff] }
 0x221   : > { %v2309_v14 = vunpack.i.h.bf16 %v2307_v38  ;;  %v2308_v22 = vunpack.i.l.bf16 %v2307_v38  ;;  %v1528_v21 = vld [vmem:[#allocation4 + $0x6e0] sm:$0xff] }
 0x222   : > { %v1265_v50 = vsel %vm628_vm6, %v2313_v12, %v2303_v6  ;;  %v1260_v61 = vsel %vm628_vm6, %v2318_v52, %v2319_v29  ;;  %v1406_v6 = vld [vmem:[#allocation4 + $0x310] sm:$0xff]  ;;  %v1492_v38 = vld [vmem:[#allocation4 + $0x5c0] sm:$0xff] }
 0x223   : > { %v1266_v31 = vsel %vm628_vm6, %v2309_v14, %v2313_v12  ;;  %v1262_v5 = vsel %vm628_vm6, %v2308_v22, %v2314_v42  ;;  %v1263_v9 = vsel %vm628_vm6, %v2304_v34, %v2308_v22  ;;  %v3269_v55 = vmax.f32 %v3210_v45, %v1265_v50  ;;  %v1342_v34 = vld [vmem:[#allocation4 + $0x110] sm:$0xff]  ;;  %1638 = vmatpush.msra.mxu3 %v1406_v6 }
 0x224   : > { %v3266_v46 = vmax.f32 %v3206_v24, %v1266_v31  ;;  %v3272_v16 = vmax.f32 %v3214_v0, %v1263_v9  ;;  %v3275_v60 = vmax.f32 %v3221_v53, %v1262_v5  ;;  %v3278_v56 = vmax.f32 %v3235_v49, %v1260_v61  ;;  %v1316_v0 = vld [vmem:[#allocation4 + $0x40] sm:$0xff]  ;;  %1598 = vmatpush.msra.mxu1 %v1342_v34  ;;  %v1526_v12 = vld [vmem:[#allocation4 + $0x6d0] sm:$0xff] }
 0x225   : > { %v1261_v53 = vsel %vm628_vm6, %v2314_v42, %v2318_v52  ;;  %v1267_v20 = vsel %vm628_vm6, %v2319_v29, %v2309_v14  ;;  %1575 = vmatpush.msra.mxu0 %v1316_v0  ;;  %1639 = vmatpush.msra.mxu3 %v1404_v10  ;;  %v1494_v42 = vld [vmem:[#allocation4 + $0x5d0] sm:$0xff]  ;;  %v1460_v52 = vld [vmem:[#allocation4 + $0x4c0] sm:$0xff] }
 0x226   : > { %v2320_v24 = vpack.i.bf16 %v3269_v55, %v3266_v46  ;;  %v2325_v45 = vpack.i.bf16 %v3272_v16, %v3263_v33  ;;  %v2330_v49 = vpack.i.bf16 %v3278_v56, %v3275_v60  ;;  %v3294_v41 = vmax.f32 %v3223_v54, %v1261_v53  ;;  %1599 = vmatpush.msra.mxu1 %v1340_v25  ;;  %v1558_v29 = vld [vmem:[#allocation4 + $0x7d0] sm:$0xff]  ;;  %v1556_v14 = vld [vmem:[#allocation4 + $0x7c0] sm:$0xff] }
 0x227   : > { %v3297_v48 = vmax.f32 %v3237_v18, %v1267_v20  ;;  %1576 = vmatpush.msra.mxu0 %v1314_v59  ;;  %v1374_v18 = vld [vmem:[#allocation4 + $0x210] sm:$0xff]  ;;  %1704 = vmatpush.msrb.mxu3 %v1562_v43  ;;  %v1520_v31 = vld [vmem:[#allocation4 + $0x6a0] sm:$0xff] }
 0x228   : > { %2321 = vrot.lane.b32.xlu1 %v2320_v24, %s2428_s15  ;;  %2326 = vrot.lane.b32.xlu0 %v2325_v45, %s2428_s15  ;;  %v1458_v22 = vld [vmem:[#allocation4 + $0x4b0] sm:$0xff]  ;;  %v1552_v5 = vld [vmem:[#allocation4 + $0x7a0] sm:$0xff] }
 0x229   : > { %2331 = vrot.lane.b32.xlu2 %v2330_v49, %s2428_s15  ;;  %1577 = vmatpush.msra.mxu0 %v1312_v57  ;;  %v2335_v54 = vpack.i.bf16 %v3294_v41, %v3297_v48  ;;  %v1522_v50 = vld [vmem:[#allocation4 + $0x6b0] sm:$0xff]  ;;  %v1484_v24 = vld [vmem:[#allocation4 + $0x580] sm:$0xff] }
 0x22a   : > { %1618 = vmatpush.msra.mxu2 %v1374_v18  ;;  %1664 = vmatpush.msrb.mxu1 %v1498_v51  ;;  %v1554_v61 = vld [vmem:[#allocation4 + $0x7b0] sm:$0xff]  ;;  %v1516_v45 = vld [vmem:[#allocation4 + $0x680] sm:$0xff] }
 0x22b   : > { %1578 = vmatpush.msra.mxu0 %v1310_v23  ;;  %1705 = vmatpush.msrb.mxu3 %v1560_v40  ;;  %v1454_v9 = vld [vmem:[#allocation4 + $0x490] sm:$0xff]  ;;  %v1548_v0 = vld [vmem:[#allocation4 + $0x780] sm:$0xff] }
 0x22c   : > { %1619 = vmatpush.msra.mxu2 %v1372_v44  ;;  %1665 = vmatpush.msrb.mxu1 %v1496_v4  ;;  %v1450_v53 = vld [vmem:[#allocation4 + $0x470] sm:$0xff]  ;;  %v1512_v59 = vld [vmem:[#allocation4 + $0x660] sm:$0xff] }
 0x22d   : > { %1579 = vmatpush.msra.mxu0 %v1308_v1  ;;  %1706 = vmatpush.msrb.mxu3 %v1558_v29  ;;  %v1482_v20 = vld [vmem:[#allocation4 + $0x570] sm:$0xff]  ;;  %v1508_v23 = vld [vmem:[#allocation4 + $0x640] sm:$0xff] }
 0x22e   : > { %1684 = vmatpush.msrb.mxu2 %v1530_v2  ;;  %1666 = vmatpush.msrb.mxu1 %v1494_v42  ;;  %v1514_v49 = vld [vmem:[#allocation4 + $0x670] sm:$0xff]  ;;  %v1540_v34 = vld [vmem:[#allocation4 + $0x740] sm:$0xff] }
 0x22f   : > { %1644 = vmatpush.msrb.mxu0 %v1466_v15  ;;  %1707 = vmatpush.msrb.mxu3 %v1556_v14  ;;  %v1510_v57 = vld [vmem:[#allocation4 + $0x650] sm:$0xff]  ;;  %v1440_v25 = vld [vmem:[#allocation4 + $0x420] sm:$0xff] }
 0x230   : > { %2336 = vrot.lane.b32.xlu0 %v2335_v54, %s2428_s15  ;;  %1685 = vmatpush.msrb.mxu2 %v1528_v21  ;;  %v1442_v54 = vld [vmem:[#allocation4 + $0x430] sm:$0xff]  ;;  %v1472_v44 = vld [vmem:[#allocation4 + $0x520] sm:$0xff]  ;;  %s2431_s15 = smov 121  }
 0x231   : > { %1645 = vmatpush.msrb.mxu0 %v1464_v30  ;;  %1667 = vmatpush.msrb.mxu1 %v1492_v38  ;;  %v1474_v18 = vld [vmem:[#allocation4 + $0x530] sm:$0xff]  ;;  %v1504_v10 = vld [vmem:[#allocation4 + $0x620] sm:$0xff] }
 0x232   : > { %1686 = vmatpush.msrb.mxu2 %v1526_v12  ;;  %1708 = vmatpush.msrb.mxu3 %v1554_v61  ;;  %v1506_v6 = vld [vmem:[#allocation4 + $0x630] sm:$0xff]  ;;  %v1536_v15 = vld [vmem:[#allocation4 + $0x720] sm:$0xff] }
 0x233   : > { %1646 = vmatpush.msrb.mxu0 %v1462_v8  ;;  %1668 = vmatpush.msrb.mxu1 %v1490_v47  ;;  %v1538_v1 = vld [vmem:[#allocation4 + $0x730] sm:$0xff]  ;;  %v1436_v4 = vld [vmem:[#allocation4 + $0x400] sm:$0xff] }
 0x234   : > { %1687 = vmatpush.msrb.mxu2 %v1524_v39  ;;  %1709 = vmatpush.msrb.mxu3 %v1552_v5  ;;  %v1438_v51 = vld [vmem:[#allocation4 + $0x410] sm:$0xff]  ;;  %v1468_v21 = vld [vmem:[#allocation4 + $0x500] sm:$0xff] }
 0x235   : > { %1647 = vmatpush.msrb.mxu0 %v1460_v52  ;;  %1669 = vmatpush.msrb.mxu1 %v1488_v3  ;;  %v1470_v2 = vld [vmem:[#allocation4 + $0x510] sm:$0xff]  ;;  %v1500_v40 = vld [vmem:[#allocation4 + $0x600] sm:$0xff] }
 0x236   : > { %1688 = vmatpush.msrb.mxu2 %v1522_v50  ;;  %1710 = vmatpush.msrb.mxu3 %v1550_v28  ;;  %v1502_v43 = vld [vmem:[#allocation4 + $0x610] sm:$0xff]  ;;  %v1532_v8 = vld [vmem:[#allocation4 + $0x700] sm:$0xff]  ;;  %v1403_v28 = vld [vmem:[#allocation4 + $0x2f8] sm:$0xff] }
 0x237   : > { %1648 = vmatpush.msrb.mxu0 %v1458_v22  ;;  %1670 = vmatpush.msrb.mxu1 %v1486_v19  ;;  %v1534_v30 = vld [vmem:[#allocation4 + $0x710] sm:$0xff]  ;;  %v1339_v19 = vld [vmem:[#allocation4 + $0xf8] sm:$0xff] }
 0x238   : > { %1689 = vmatpush.msrb.mxu2 %v1520_v31  ;;  %1711 = vmatpush.msrb.mxu3 %v1548_v0 }
 0x239   : > { %1649 = vmatpush.msrb.mxu0 %v1456_v17  ;;  %1671 = vmatpush.msrb.mxu1 %v1484_v24  ;;  %v1401_v24 = vld [vmem:[#allocation4 + $0x2e8] sm:$0xff] }
 0x23a   : > { %1690 = vmatpush.msrb.mxu2 %v1518_v58  ;;  %1712 = vmatpush.msrb.mxu3 %v1546_v35  ;;  %v1371_v58 = vld [vmem:[#allocation4 + $0x1f8] sm:$0xff] }
 0x23b   : > { %1650 = vmatpush.msrb.mxu0 %v1454_v9  ;;  %1672 = vmatpush.msrb.mxu1 %v1482_v20  ;;  %v1335_v20 = vld [vmem:[#allocation4 + $0xd8] sm:$0xff] }
 0x23c   : > { %1691 = vmatpush.msrb.mxu2 %v1516_v45  ;;  %1713 = vmatpush.msrb.mxu3 %v1544_v62  ;;  %v1399_v35 = vld [vmem:[#allocation4 + $0x2d8] sm:$0xff]  ;;  %v1333_v62 = vld [vmem:[#allocation4 + $0xc8] sm:$0xff] }
 0x23d   : > { %1651 = vmatpush.msrb.mxu0 %v1452_v11  ;;  %1673 = vmatpush.msrb.mxu1 %v1480_v37  ;;  %v1435_v11 = vld [vmem:[#allocation4 + $0x3f8] sm:$0xff] }
 0x23e   : > { %1692 = vmatpush.msrb.mxu2 %v1514_v49  ;;  %1714 = vmatpush.msrb.mxu3 %v1542_v36  ;;  %v1367_v49 = vld [vmem:[#allocation4 + $0x1d8] sm:$0xff]  ;;  %v1429_v36 = vld [vmem:[#allocation4 + $0x3c8] sm:$0xff] }
 0x23f   : > { %1652 = vmatpush.msrb.mxu0 %v1450_v53  ;;  %1674 = vmatpush.msrb.mxu1 %v1478_v32 }
 0x240   : > { %1693 = vmatpush.msrb.mxu2 %v1512_v59  ;;  %1715 = vmatpush.msrb.mxu3 %v1540_v34 }
 0x241   : > { %1653 = vmatpush.msrb.mxu0 %v1448_v7  ;;  %1675 = vmatpush.msrb.mxu1 %v1476_v13  ;;  %v1431_v7 = vld [vmem:[#allocation4 + $0x3d8] sm:$0xff] }
 0x242   : > { %1694 = vmatpush.msrb.mxu2 %v1510_v57  ;;  %1716 = vmatpush.msrb.mxu3 %v1538_v1  ;;  %v1397_v57 = vld [vmem:[#allocation4 + $0x2c8] sm:$0xff] }
 0x243   : > { %1654 = vmatpush.msrb.mxu0 %v1446_v63  ;;  %1676 = vmatpush.msrb.mxu1 %v1474_v18  ;;  %v1365_v63 = vld [vmem:[#allocation4 + $0x1c8] sm:$0xff]  ;;  %v1363_v18 = vld [vmem:[#allocation4 + $0x1b8] sm:$0xff] }
 0x244   : > { %1695 = vmatpush.msrb.mxu2 %v1508_v23  ;;  %1717 = vmatpush.msrb.mxu3 %v1536_v15  ;;  %v1361_v1 = vld [vmem:[#allocation4 + $0x1a8] sm:$0xff]  ;;  %v1391_v15 = vld [vmem:[#allocation4 + $0x298] sm:$0xff] }
 0x245   : > { %1655 = vmatpush.msrb.mxu0 %v1444_v27  ;;  %1677 = vmatpush.msrb.mxu1 %v1472_v44  ;;  %v1327_v44 = vld [vmem:[#allocation4 + $0x98] sm:$0xff] }
 0x246   : > { %1696 = vmatpush.msrb.mxu2 %v1506_v6  ;;  %1718 = vmatpush.msrb.mxu3 %v1534_v30  ;;  %v1329_v6 = vld [vmem:[#allocation4 + $0xa8] sm:$0xff] }
 0x247   : > { %1656 = vmatpush.msrb.mxu0 %v1442_v54  ;;  %1678 = vmatpush.msrb.mxu1 %v1470_v2  ;;  %v1325_v2 = vld [vmem:[#allocation4 + $0x88] sm:$0xff] }
 0x248   : > { %1697 = vmatpush.msrb.mxu2 %v1504_v10  ;;  %1719 = vmatpush.msrb.mxu3 %v1532_v8  ;;  %v1359_v10 = vld [vmem:[#allocation4 + $0x198] sm:$0xff]  ;;  %v1389_v30 = vld [vmem:[#allocation4 + $0x288] sm:$0xff] }
 0x249   : > { %1657 = vmatpush.msrb.mxu0 %v1440_v25  ;;  %1679 = vmatpush.msrb.mxu1 %v1468_v21  ;;  %v1425_v25 = vld [vmem:[#allocation4 + $0x3a8] sm:$0xff]  ;;  %v1323_v21 = vld [vmem:[#allocation4 + $0x78] sm:$0xff] }
 0x24a   : > { %1698 = vmatpush.msrb.mxu2 %v1502_v43  ;;  %v1357_v43 = vld [vmem:[#allocation4 + $0x188] sm:$0xff]  ;;  %v1387_v8 = vld [vmem:[#allocation4 + $0x278] sm:$0xff] }
 0x24b   : > { %1658 = vmatpush.msrb.mxu0 %v1438_v51  ;;  %v1423_v51 = vld [vmem:[#allocation4 + $0x398] sm:$0xff] }
 0x24c   : > { %1699 = vmatpush.msrb.mxu2 %v1500_v40  ;;  %v1355_v40 = vld [vmem:[#allocation4 + $0x178] sm:$0xff] }
 0x24d   : > { %1659 = vmatpush.msrb.mxu0 %v1436_v4  ;;  %v1421_v4 = vld [vmem:[#allocation4 + $0x388] sm:$0xff] }
 0x283   : > { %v2332_v42 = vpop.permute.xlu2 %2331 }
 0x284   : > { %v2333_v12 = vunpack.i.l.bf16 %v2332_v42  ;;  %v2334_v45 = vunpack.i.h.bf16 %v2332_v42  ;;  %v1419_v42 = vld [vmem:[#allocation4 + $0x378] sm:$0xff] }
 0x29a   : > { %v2322_v29 = vpop.permute.xlu1 %2321  ;;  %v2327_v52 = vpop.permute.xlu0 %2326 }
 0x29b   : > { %v2324_v38 = vunpack.i.h.bf16 %v2322_v29  ;;  %v2323_v39 = vunpack.i.l.bf16 %v2322_v29  ;;  %v2329_v14 = vunpack.i.h.bf16 %v2327_v52  ;;  %v2328_v22 = vunpack.i.l.bf16 %v2327_v52  ;;  %v1353_v29 = vld [vmem:[#allocation4 + $0x168] sm:$0xff] }
 0x29c   : > { %v1385_v52 = vld [vmem:[#allocation4 + $0x268] sm:$0xff] }
 0x29d   : > { %v1295_v47 = vsel %vm736_vm9, %v2329_v14, %v2333_v12  ;;  %v1296_v50 = vsel %vm736_vm9, %v2328_v22, %v2329_v14  ;;  %v1298_v61 = vsel %vm736_vm9, %v2323_v39, %v2324_v38  ;;  %v1297_v17 = vsel %vm736_vm9, %v2324_v38, %v2328_v22  ;;  %v1417_v38 = vld [vmem:[#allocation4 + $0x368] sm:$0xff]  ;;  %v1351_v14 = vld [vmem:[#allocation4 + $0x158] sm:$0xff] }
 0x29e   : > { %v3311_v3 = vmax.f32 %v3263_v33, %v1296_v50  ;;  %v3314_v31 = vmax.f32 %v3272_v16, %v1295_v47  ;;  %v3317_v5 = vmax.f32 %v3266_v46, %v1298_v61  ;;  %v3320_v9 = vmax.f32 %v3269_v55, %v1297_v17  ;;  %v1337_v33 = vld [vmem:[#allocation4 + $0xe8] sm:$0xff]  ;;  %v1383_v22 = vld [vmem:[#allocation4 + $0x258] sm:$0xff] }
 0x29f   : > { %v1369_v16 = vld [vmem:[#allocation4 + $0x1e8] sm:$0xff]  ;;  %v1415_v47 = vld [vmem:[#allocation4 + $0x358] sm:$0xff] }
 0x2a0   : > { %1580 = vmatmul.f32.vlgmr.msra.gmra.mxu0 %v3317_v5  ;;  %1600 = vmatmul.f32.vlgmr.msra.gmra.mxu1 %v3320_v9  ;;  %v1433_v55 = vld [vmem:[#allocation4 + $0x3e8] sm:$0xff] }
 0x2a1   : > { %1620 = vmatmul.f32.vlgmr.msra.gmra.mxu2 %v3311_v3  ;;  %1640 = vmatmul.f32.vlgmr.msra.gmra.mxu3 %v3314_v31  ;;  %v1317_v50 = vld [vmem:[#allocation4 + $0x48] sm:$0xff] }
 0x2a2   : > { %1724 = vmatpush.msra.mxu0 %v1339_v19  ;;  %1744 = vmatpush.msra.mxu1 %v1371_v58  ;;  %v2337_v46 = vpop.permute.xlu0 %2336  ;;  %v1349_v61 = vld [vmem:[#allocation4 + $0x148] sm:$0xff]  ;;  %v1315_v58 = vld [vmem:[#allocation4 + $0x38] sm:$0xff] }
 0x2a3   : > { %1764 = vmatpush.msra.mxu2 %v1403_v28  ;;  %1784 = vmatpush.msra.mxu3 %v1435_v11  ;;  %v2339_v0 = vunpack.i.h.bf16 %v2337_v46  ;;  %v2338_v53 = vunpack.i.l.bf16 %v2337_v46  ;;  %v1381_v17 = vld [vmem:[#allocation4 + $0x248] sm:$0xff]  ;;  %v1347_v28 = vld [vmem:[#allocation4 + $0x138] sm:$0xff] }
 0x2a4   : > { %1725 = vmatpush.msra.mxu0 %v1337_v33  ;;  %1745 = vmatpush.msra.mxu1 %v1369_v16  ;;  %v1413_v19 = vld [vmem:[#allocation4 + $0x348] sm:$0xff]  ;;  %v1379_v11 = vld [vmem:[#allocation4 + $0x238] sm:$0xff] }
 0x2a5   : > { %v1292_v37 = vsel %vm736_vm9, %v2334_v45, %v2338_v53  ;;  %v1299_v59 = vsel %vm736_vm9, %v2338_v53, %v2323_v39  ;;  %1765 = vmatpush.msra.mxu2 %v1401_v24  ;;  %1785 = vmatpush.msra.mxu3 %v1433_v55  ;;  %v1294_v32 = vsel %vm736_vm9, %v2333_v12, %v2339_v0  ;;  %v1321_v12 = vld [vmem:[#allocation4 + $0x68] sm:$0xff]  ;;  %v1319_v39 = vld [vmem:[#allocation4 + $0x58] sm:$0xff] }
 0x2a6   : > { %1726 = vmatpush.msra.mxu0 %v1335_v20  ;;  %1746 = vmatpush.msra.mxu1 %v1367_v49  ;;  %v3333_v27 = vmax.f32 %v3275_v60, %v1294_v32  ;;  %v3336_v13 = vmax.f32 %v3278_v56, %v1292_v37  ;;  %v3339_v23 = vmax.f32 %v3297_v48, %v1299_v59  ;;  %v1331_v60 = vld [vmem:[#allocation4 + $0xb8] sm:$0xff]  ;;  %v1313_v16 = vld [vmem:[#allocation4 + $0x28] sm:$0xff] }
 0x2a7   : > { %1766 = vmatpush.msra.mxu2 %v1399_v35  ;;  %1786 = vmatpush.msra.mxu3 %v1431_v7  ;;  %v1293_v34 = vsel %vm736_vm9, %v2339_v0, %v2334_v45  ;;  %v1395_v56 = vld [vmem:[#allocation4 + $0x2b8] sm:$0xff]  ;;  %v1345_v46 = vld [vmem:[#allocation4 + $0x128] sm:$0xff] }
 0x2a8   : > { %1727 = vmatpush.msra.mxu0 %v1333_v62  ;;  %1747 = vmatpush.msra.mxu1 %v1365_v63  ;;  %v3344_v54 = vmax.f32 %v3294_v41, %v1293_v34  ;;  %v1427_v48 = vld [vmem:[#allocation4 + $0x3b8] sm:$0xff]  ;;  %v1393_v41 = vld [vmem:[#allocation4 + $0x2a8] sm:$0xff] }
 0x2a9   : > { %1767 = vmatpush.msra.mxu2 %v1397_v57  ;;  %1787 = vmatpush.msra.mxu3 %v1429_v36  ;;  %v1411_v33 = vld [vmem:[#allocation4 + $0x338] sm:$0xff]  ;;  %v1377_v24 = vld [vmem:[#allocation4 + $0x228] sm:$0xff] }
 0x2aa   : > { %1660 = vmatmul.f32.vlgmr.msrb.gmra.mxu0 %v3333_v27  ;;  %1680 = vmatmul.f32.vlgmr.msrb.gmra.mxu1 %v3344_v54  ;;  %v1409_v55 = vld [vmem:[#allocation4 + $0x328] sm:$0xff]  ;;  %v1311_v45 = vld [vmem:[#allocation4 + $0x18] sm:$0xff] }
 0x2ab   : > { %1700 = vmatmul.f32.vlgmr.msrb.gmra.mxu2 %v3336_v13  ;;  %1720 = vmatmul.f32.vlgmr.msrb.gmra.mxu3 %v3339_v23  ;;  %v1343_v0 = vld [vmem:[#allocation4 + $0x118] sm:$0xff]  ;;  %v1309_v49 = vld [vmem:[#allocation4 + $0x8] sm:$0xff] }
 0x2ac   : > { %1728 = vmatpush.msra.mxu0 %v1331_v60  ;;  %1748 = vmatpush.msra.mxu1 %v1363_v18  ;;  %v1375_v53 = vld [vmem:[#allocation4 + $0x218] sm:$0xff]  ;;  %v1341_v35 = vld [vmem:[#allocation4 + $0x108] sm:$0xff] }
 0x2ad   : > { %1768 = vmatpush.msra.mxu2 %v1395_v56  ;;  %1788 = vmatpush.msra.mxu3 %v1427_v48  ;;  %v1407_v20 = vld [vmem:[#allocation4 + $0x318] sm:$0xff]  ;;  %v1373_v7 = vld [vmem:[#allocation4 + $0x208] sm:$0xff] }
 0x2ae   : > { %1729 = vmatpush.msra.mxu0 %v1329_v6  ;;  %1749 = vmatpush.msra.mxu1 %v1361_v1  ;;  %v1405_v37 = vld [vmem:[#allocation4 + $0x308] sm:$0xff]  ;;  %v1467_v59 = vld [vmem:[#allocation4 + $0x4f8] sm:$0xff] }
 0x2af   : > { %1769 = vmatpush.msra.mxu2 %v1393_v41  ;;  %1789 = vmatpush.msra.mxu3 %v1425_v25  ;;  %v1499_v62 = vld [vmem:[#allocation4 + $0x5f8] sm:$0xff]  ;;  %v1465_v57 = vld [vmem:[#allocation4 + $0x4e8] sm:$0xff] }
 0x2b0   : > { %1730 = vmatpush.msra.mxu0 %v1327_v44  ;;  %1750 = vmatpush.msra.mxu1 %v1359_v10  ;;  %v1531_v63 = vld [vmem:[#allocation4 + $0x6f8] sm:$0xff]  ;;  %v1497_v36 = vld [vmem:[#allocation4 + $0x5e8] sm:$0xff] }
 0x2b1   : > { %1770 = vmatpush.msra.mxu2 %v1391_v15  ;;  %1790 = vmatpush.msra.mxu3 %v1423_v51  ;;  %v1563_v32 = vld [vmem:[#allocation4 + $0x7f8] sm:$0xff]  ;;  %v1529_v34 = vld [vmem:[#allocation4 + $0x6e8] sm:$0xff] }
 0x2b2   : > { %1731 = vmatpush.msra.mxu0 %v1325_v2  ;;  %1751 = vmatpush.msra.mxu1 %v1357_v43  ;;  %v1561_v60 = vld [vmem:[#allocation4 + $0x7e8] sm:$0xff]  ;;  %v1463_v18 = vld [vmem:[#allocation4 + $0x4d8] sm:$0xff] }
 0x2b3   : > { %1771 = vmatpush.msra.mxu2 %v1389_v30  ;;  %1791 = vmatpush.msra.mxu3 %v1421_v4  ;;  %v1495_v56 = vld [vmem:[#allocation4 + $0x5d8] sm:$0xff]  ;;  %v1461_v48 = vld [vmem:[#allocation4 + $0x4c8] sm:$0xff] }
 0x2b4   : > { %1732 = vmatpush.msra.mxu0 %v1323_v21  ;;  %1752 = vmatpush.msra.mxu1 %v1355_v40  ;;  %v1557_v6 = vld [vmem:[#allocation4 + $0x7c8] sm:$0xff]  ;;  %v1459_v1 = vld [vmem:[#allocation4 + $0x4b8] sm:$0xff] }
 0x2b5   : > { %1772 = vmatpush.msra.mxu2 %v1387_v8  ;;  %1792 = vmatpush.msra.mxu3 %v1419_v42  ;;  %v1491_v41 = vld [vmem:[#allocation4 + $0x5b8] sm:$0xff]  ;;  %v1457_v10 = vld [vmem:[#allocation4 + $0x4a8] sm:$0xff] }
 0x2b6   : > { %1733 = vmatpush.msra.mxu0 %v1321_v12  ;;  %1753 = vmatpush.msra.mxu1 %v1353_v29  ;;  %v1523_v25 = vld [vmem:[#allocation4 + $0x6b8] sm:$0xff]  ;;  %v1489_v15 = vld [vmem:[#allocation4 + $0x5a8] sm:$0xff] }
 0x2b7   : > { %1773 = vmatpush.msra.mxu2 %v1385_v52  ;;  %1793 = vmatpush.msra.mxu3 %v1417_v38  ;;  %v1555_v44 = vld [vmem:[#allocation4 + $0x7b8] sm:$0xff]  ;;  %v1521_v51 = vld [vmem:[#allocation4 + $0x6a8] sm:$0xff] }
 0x2b8   : > { %1734 = vmatpush.msra.mxu0 %v1319_v39  ;;  %1754 = vmatpush.msra.mxu1 %v1351_v14  ;;  %v1553_v2 = vld [vmem:[#allocation4 + $0x7a8] sm:$0xff]  ;;  %v1455_v43 = vld [vmem:[#allocation4 + $0x498] sm:$0xff] }
 0x2b9   : > { %1774 = vmatpush.msra.mxu2 %v1383_v22  ;;  %1794 = vmatpush.msra.mxu3 %v1415_v47  ;;  %v1487_v30 = vld [vmem:[#allocation4 + $0x598] sm:$0xff]  ;;  %v1453_v40 = vld [vmem:[#allocation4 + $0x488] sm:$0xff] }
 0x2ba   : > { %1735 = vmatpush.msra.mxu0 %v1317_v50  ;;  %1755 = vmatpush.msra.mxu1 %v1349_v61  ;;  %v1519_v4 = vld [vmem:[#allocation4 + $0x698] sm:$0xff]  ;;  %v1485_v8 = vld [vmem:[#allocation4 + $0x588] sm:$0xff] }
 0x2bb   : > { %1775 = vmatpush.msra.mxu2 %v1381_v17  ;;  %1795 = vmatpush.msra.mxu3 %v1413_v19  ;;  %v1551_v21 = vld [vmem:[#allocation4 + $0x798] sm:$0xff]  ;;  %v1517_v42 = vld [vmem:[#allocation4 + $0x688] sm:$0xff] }
 0x2bc   : > { %1736 = vmatpush.msra.mxu0 %v1315_v58  ;;  %1756 = vmatpush.msra.mxu1 %v1347_v28  ;;  %v1549_v12 = vld [vmem:[#allocation4 + $0x788] sm:$0xff]  ;;  %v1451_v29 = vld [vmem:[#allocation4 + $0x478] sm:$0xff] }
 0x2bd   : > { %1776 = vmatpush.msra.mxu2 %v1379_v11  ;;  %1796 = vmatpush.msra.mxu3 %v1411_v33  ;;  %v1483_v52 = vld [vmem:[#allocation4 + $0x578] sm:$0xff]  ;;  %v1449_v14 = vld [vmem:[#allocation4 + $0x468] sm:$0xff] }
 0x2be   : > { %1737 = vmatpush.msra.mxu0 %v1313_v16  ;;  %1757 = vmatpush.msra.mxu1 %v1345_v46  ;;  %v1515_v38 = vld [vmem:[#allocation4 + $0x678] sm:$0xff]  ;;  %v1481_v22 = vld [vmem:[#allocation4 + $0x568] sm:$0xff] }
 0x2bf   : > { %1777 = vmatpush.msra.mxu2 %v1377_v24  ;;  %1797 = vmatpush.msra.mxu3 %v1409_v55  ;;  %v1547_v39 = vld [vmem:[#allocation4 + $0x778] sm:$0xff]  ;;  %v1513_v47 = vld [vmem:[#allocation4 + $0x668] sm:$0xff] }
 0x2c0   : > { %1738 = vmatpush.msra.mxu0 %v1311_v45  ;;  %1758 = vmatpush.msra.mxu1 %v1343_v0  ;;  %v1545_v50 = vld [vmem:[#allocation4 + $0x768] sm:$0xff]  ;;  %v1447_v61 = vld [vmem:[#allocation4 + $0x458] sm:$0xff] }
 0x2c1   : > { %1778 = vmatpush.msra.mxu2 %v1375_v53  ;;  %1798 = vmatpush.msra.mxu3 %v1407_v20  ;;  %v1479_v17 = vld [vmem:[#allocation4 + $0x558] sm:$0xff]  ;;  %v1445_v28 = vld [vmem:[#allocation4 + $0x448] sm:$0xff] }
 0x2c2   : > { %1739 = vmatpush.msra.mxu0 %v1309_v49  ;;  %1759 = vmatpush.msra.mxu1 %v1341_v35  ;;  %v1511_v19 = vld [vmem:[#allocation4 + $0x658] sm:$0xff]  ;;  %v1477_v11 = vld [vmem:[#allocation4 + $0x548] sm:$0xff] }
 0x2c3   : > { %1779 = vmatpush.msra.mxu2 %v1373_v7  ;;  %1799 = vmatpush.msra.mxu3 %v1405_v37  ;;  %v1543_v58 = vld [vmem:[#allocation4 + $0x758] sm:$0xff]  ;;  %v1509_v33 = vld [vmem:[#allocation4 + $0x648] sm:$0xff] }
 0x2c4   : > { %1740 = vmatmul.f32.vlgmr.msra.gmra.mxu0 %v3317_v5  ;;  %1760 = vmatmul.f32.vlgmr.msra.gmra.mxu1 %v3320_v9  ;;  %v1527_v5 = vld [vmem:[#allocation4 + $0x6d8] sm:$0xff]  ;;  %v1541_v16 = vld [vmem:[#allocation4 + $0x748] sm:$0xff] }
 0x2c5   : > { %1780 = vmatmul.f32.vlgmr.msra.gmra.mxu2 %v3311_v3  ;;  %1800 = vmatmul.f32.vlgmr.msra.gmra.mxu3 %v3314_v31  ;;  %v1559_v9 = vld [vmem:[#allocation4 + $0x7d8] sm:$0xff]  ;;  %v1493_v3 = vld [vmem:[#allocation4 + $0x5c8] sm:$0xff] }
 0x2c6   : > { %1804 = vmatpush.msrb.mxu0 %v1467_v59  ;;  %1824 = vmatpush.msrb.mxu1 %v1499_v62  ;;  %v1525_v31 = vld [vmem:[#allocation4 + $0x6c8] sm:$0xff]  ;;  %v1443_v46 = vld [vmem:[#allocation4 + $0x438] sm:$0xff] }
 0x2c7   : > { %1844 = vmatpush.msrb.mxu2 %v1531_v63  ;;  %1864 = vmatpush.msrb.mxu3 %v1563_v32  ;;  %v1475_v24 = vld [vmem:[#allocation4 + $0x538] sm:$0xff]  ;;  %v1441_v0 = vld [vmem:[#allocation4 + $0x428] sm:$0xff] }
 0x2c8   : > { %1805 = vmatpush.msrb.mxu0 %v1465_v57  ;;  %1825 = vmatpush.msrb.mxu1 %v1497_v36  ;;  %v1507_v55 = vld [vmem:[#allocation4 + $0x638] sm:$0xff]  ;;  %v1473_v53 = vld [vmem:[#allocation4 + $0x528] sm:$0xff] }
 0x2c9   : > { %1845 = vmatpush.msrb.mxu2 %v1529_v34  ;;  %1865 = vmatpush.msrb.mxu3 %v1561_v60  ;;  %v1539_v45 = vld [vmem:[#allocation4 + $0x738] sm:$0xff]  ;;  %v1505_v20 = vld [vmem:[#allocation4 + $0x628] sm:$0xff] }
 0x2ca   : > { %1806 = vmatpush.msrb.mxu0 %v1463_v18  ;;  %1826 = vmatpush.msrb.mxu1 %v1495_v56  ;;  %v1537_v49 = vld [vmem:[#allocation4 + $0x728] sm:$0xff]  ;;  %v1439_v35 = vld [vmem:[#allocation4 + $0x418] sm:$0xff] }
 0x2cb   : > { %1846 = vmatpush.msrb.mxu2 %v1527_v5  ;;  %1866 = vmatpush.msrb.mxu3 %v1559_v9  ;;  %v1471_v7 = vld [vmem:[#allocation4 + $0x518] sm:$0xff]  ;;  %v1437_v62 = vld [vmem:[#allocation4 + $0x408] sm:$0xff] }
 0x2cc   : > { %1807 = vmatpush.msrb.mxu0 %v1461_v48  ;;  %1827 = vmatpush.msrb.mxu1 %v1493_v3  ;;  %v1503_v37 = vld [vmem:[#allocation4 + $0x618] sm:$0xff]  ;;  %v1469_v63 = vld [vmem:[#allocation4 + $0x508] sm:$0xff] }
 0x2cd   : > { %1847 = vmatpush.msrb.mxu2 %v1525_v31  ;;  %1867 = vmatpush.msrb.mxu3 %v1557_v6  ;;  %v1535_v59 = vld [vmem:[#allocation4 + $0x718] sm:$0xff]  ;;  %v1501_v32 = vld [vmem:[#allocation4 + $0x608] sm:$0xff] }
 0x2ce   : > { %1808 = vmatpush.msrb.mxu0 %v1459_v1  ;;  %1828 = vmatpush.msrb.mxu1 %v1491_v41  ;;  %v1533_v57 = vld [vmem:[#allocation4 + $0x708] sm:$0xff] }
 0x2cf   : > { %1848 = vmatpush.msrb.mxu2 %v1523_v25  ;;  %1868 = vmatpush.msrb.mxu3 %v1555_v44 }
 0x2d0   : > { %1809 = vmatpush.msrb.mxu0 %v1457_v10  ;;  %1829 = vmatpush.msrb.mxu1 %v1489_v15 }
 0x2d1   : > { %1849 = vmatpush.msrb.mxu2 %v1521_v51  ;;  %1869 = vmatpush.msrb.mxu3 %v1553_v2 }
 0x2d2   : > { %1810 = vmatpush.msrb.mxu0 %v1455_v43  ;;  %1830 = vmatpush.msrb.mxu1 %v1487_v30 }
 0x2d3   : > { %1850 = vmatpush.msrb.mxu2 %v1519_v4  ;;  %1870 = vmatpush.msrb.mxu3 %v1551_v21 }
 0x2d4   : > { %1811 = vmatpush.msrb.mxu0 %v1453_v40  ;;  %1831 = vmatpush.msrb.mxu1 %v1485_v8 }
 0x2d5   : > { %1851 = vmatpush.msrb.mxu2 %v1517_v42  ;;  %1871 = vmatpush.msrb.mxu3 %v1549_v12 }
 0x2d6   : > { %1812 = vmatpush.msrb.mxu0 %v1451_v29  ;;  %1832 = vmatpush.msrb.mxu1 %v1483_v52  ;;  %v2244_v52 = vld [vmem:[%s3459_s6 + $0x10] ss:$8 sm:$0x3] }
 0x2d7   : > { %1852 = vmatpush.msrb.mxu2 %v1515_v38  ;;  %1872 = vmatpush.msrb.mxu3 %v1547_v39  ;;  %v2007_v39 = vperm.slane %v2244_v52, 0 }
 0x2d8   : > { %1813 = vmatpush.msrb.mxu0 %v1449_v14  ;;  %1833 = vmatpush.msrb.mxu1 %v1481_v22  ;;  %v2008_v14 = vperm.slane %v2244_v52, 1 }
 0x2d9   : > { %1853 = vmatpush.msrb.mxu2 %v1513_v47  ;;  %1873 = vmatpush.msrb.mxu3 %v1545_v50 }
 0x2da   : > { %1814 = vmatpush.msrb.mxu0 %v1447_v61  ;;  %1834 = vmatpush.msrb.mxu1 %v1479_v17 }
 0x2db   : > { %1854 = vmatpush.msrb.mxu2 %v1511_v19  ;;  %1874 = vmatpush.msrb.mxu3 %v1543_v58 }
 0x2dc   : > { %1815 = vmatpush.msrb.mxu0 %v1445_v28  ;;  %1835 = vmatpush.msrb.mxu1 %v1477_v11 }
 0x2dd   : > { %1855 = vmatpush.msrb.mxu2 %v1509_v33  ;;  %1875 = vmatpush.msrb.mxu3 %v1541_v16  ;;  %v2243_v33 = vld [vmem:[%s3459_s6 + $0x7] ss:$8 sm:$0x3]  ;;  %v2242_v16 = vld [vmem:[%s3459_s6 + $0x6] ss:$8 sm:$0x3] }
 0x2de   : > { %1816 = vmatpush.msrb.mxu0 %v1443_v46  ;;  %1836 = vmatpush.msrb.mxu1 %v1475_v24  ;;  %v1887_v46 = vld [vmem:[%s3458_s5 + $0x8] sm:$0xff]  ;;  %v1886_v24 = vld [vmem:[%s3458_s5] sm:$0xff] }
 0x2df   : > { %1856 = vmatpush.msrb.mxu2 %v1507_v55  ;;  %1876 = vmatpush.msrb.mxu3 %v1539_v45  ;;  %v1991_v45 = vperm.slane %v2243_v33, 0 }
 0x2e0   : > { %1817 = vmatpush.msrb.mxu0 %v1441_v0  ;;  %1837 = vmatpush.msrb.mxu1 %v1473_v53  ;;  %v1992_v0 = vperm.slane %v2243_v33, 1  ;;  %v2241_v53 = vld [vmem:[%s3459_s6 + $0x5] ss:$8 sm:$0x3] }
 0x2e1   : > { %1857 = vmatpush.msrb.mxu2 %v1505_v20  ;;  %1877 = vmatpush.msrb.mxu3 %v1537_v49  ;;  %v1975_v49 = vperm.slane %v2242_v16, 0 }
 0x2e2   : > { %1818 = vmatpush.msrb.mxu0 %v1439_v35  ;;  %1838 = vmatpush.msrb.mxu1 %v1471_v7  ;;  %v1976_v35 = vperm.slane %v2242_v16, 1 }
 0x2e3   : > { %1858 = vmatpush.msrb.mxu2 %v1503_v37  ;;  %1878 = vmatpush.msrb.mxu3 %v1535_v59 }
 0x2e4   : > { %1819 = vmatpush.msrb.mxu0 %v1437_v62  ;;  %1839 = vmatpush.msrb.mxu1 %v1469_v63 }
 0x2e5   : > { %1859 = vmatpush.msrb.mxu2 %v1501_v32  ;;  %1879 = vmatpush.msrb.mxu3 %v1533_v57  ;;  %v1959_v32 = vperm.slane %v2241_v53, 0  ;;  %v1960_v57 = vperm.slane %v2241_v53, 1 }
 0x2e6   : > { %1820 = vmatmul.f32.vlgmr.msrb.gmra.mxu0 %v3333_v27  ;;  %1840 = vmatmul.f32.vlgmr.msrb.gmra.mxu1 %v3344_v54 }
 0x2e7   : > { %1860 = vmatmul.f32.vlgmr.msrb.gmra.mxu2 %v3336_v13  ;;  %1880 = vmatmul.f32.vlgmr.msrb.gmra.mxu3 %v3339_v23 }
 0x31d   : > { %v1581_v36 = vpop.f32.mrf.mxu0  ;;  %v1601_v34 = vpop.f32.mrf.mxu1 }
 0x31e   : > { %v1602_v60 = vadd.f32 %v1601_v34, %v1581_v36 }
 0x324   : > { %v1621_v18 = vpop.f32.mrf.mxu2  ;;  %v1641_v5 = vpop.f32.mrf.mxu3 }
 0x325   : > { %v1622_v56 = vadd.f32 %v1621_v18, %v1602_v60 }
 0x327   : > { %v1642_v9 = vadd.f32 %v1641_v5, %v1622_v56  ;;  %v1661_v48 = vpop.f32.mrf.mxu0  ;;  %v1681_v31 = vpop.f32.mrf.mxu1  ;;  %v2240_v56 = vld [vmem:[%s3459_s6 + $0x3] ss:$8 sm:$0x3] }
 0x329   : > { %v1662_v3 = vadd.f32 %v1661_v48, %v1642_v9  ;;  %v2239_v48 = vld [vmem:[%s3459_s6 + $0x2] ss:$8 sm:$0x3] }
 0x32b   : > { %v1682_v6 = vadd.f32 %v1681_v31, %v1662_v3 }
 0x32e   : > { %v1701_v1 = vpop.f32.mrf.mxu2  ;;  %v1721_v27 = vpop.f32.mrf.mxu3 }
 0x32f   : > { %v1702_v41 = vadd.f32 %v1701_v1, %v1682_v6  ;;  %v1944_v6 = vperm.slane %v2240_v56, 0  ;;  %v1945_v1 = vperm.slane %v2240_v56, 1 }
 0x331   : > { %v3358_v25 = vadd.f32 %v1721_v27, %v1702_v41  ;;  %v2238_v41 = vld [vmem:[%s3459_s6 + $0x1] ss:$8 sm:$0x3] }
 0x333   : > { %1965 = vrot.lane.b32.xlu2 %v3358_v25, %s2431_s15  ;;  %1981 = vrot.lane.b32.xlu0 %v3358_v25, %s2432_s27 }
 0x334   : > { %1997 = vrot.lane.b32.xlu1 %v3358_v25, %s2433_s28 }
 0x33b   : > { %1919 = vrot.lane.b32.xlu2 %v3358_v25, %s2434_s29  ;;  %1935 = vrot.lane.b32.xlu0 %v3358_v25, %s2425_s11 }
 0x33c   : > { %1950 = vrot.lane.b32.xlu1 %v3358_v25, %s2426_s12 }
 0x341   : > { %v1741_v13 = vpop.f32.mrf.mxu0  ;;  %v1761_v23 = vpop.f32.mrf.mxu1 }
 0x342   : > { %v1762_v44 = vadd.f32 %v1761_v23, %v1741_v13  ;;  %v1929_v23 = vperm.slane %v2239_v48, 0 }
 0x344   : > { %1903 = vrot.lane.b32.xlu1 %v3358_v25, %s2435_s10 }
 0x348   : > { %v1781_v54 = vpop.f32.mrf.mxu2  ;;  %v1801_v15 = vpop.f32.mrf.mxu3 }
 0x349   : > { %v1782_v10 = vadd.f32 %v1781_v54, %v1762_v44  ;;  %v1930_v54 = vperm.slane %v2239_v48, 1 }
 0x34b   : > { %v1802_v51 = vadd.f32 %v1801_v15, %v1782_v10 }
 0x363   : > { %v1821_v2 = vpop.f32.mrf.mxu0  ;;  %v1841_v30 = vpop.f32.mrf.mxu1 }
 0x364   : > { %v1822_v43 = vadd.f32 %v1821_v2, %v1802_v51 }
 0x366   : > { %v1842_v4 = vadd.f32 %v1841_v30, %v1822_v43  ;;  %v1913_v43 = vperm.slane %v2238_v41, 0  ;;  %v1914_v30 = vperm.slane %v2238_v41, 1 }
 0x36a   : > { %v1861_v21 = vpop.f32.mrf.mxu2  ;;  %v1881_v8 = vpop.f32.mrf.mxu3 }
 0x36b   : > { %v1862_v40 = vadd.f32 %v1861_v21, %v1842_v4 }
 0x36d   : > { %v3369_v42 = vadd.f32 %v1881_v8, %v1862_v40 }
 0x36f   : > { %1999 = vrot.lane.b32.xlu2 %v3369_v42, %s2433_s28  ;;  %1967 = vrot.lane.b32.xlu0 %v3369_v42, %s2431_s15 }
 0x370   : > { %1983 = vrot.lane.b32.xlu1 %v3369_v42, %s2432_s27 }
 0x377   : > { %1952 = vrot.lane.b32.xlu2 %v3369_v42, %s2426_s12  ;;  %1921 = vrot.lane.b32.xlu0 %v3369_v42, %s2434_s29 }
 0x378   : > { %1937 = vrot.lane.b32.xlu1 %v3369_v42, %s2425_s11 }
 0x37f   : > { %1905 = vrot.lane.b32.xlu2 %v3369_v42, %s2435_s10  ;;  %1888 = vrot.lane.b32.xlu0 %v3358_v25, %s2436_s17 }
 0x380   : > { %1890 = vrot.lane.b32.xlu1 %v3369_v42, %s2436_s17 }
 0x387   : > { %2020 = vperm.xlu0 %2341, %v1887_v46   ;;  %2015 = vperm.xlu2 %2340, %v1886_v24  }
 0x38d   : > { %v1966_v12 = vpop.permute.xlu2 %1965 }
 0x395   : > { %v3382_v29 = vpop.permute.xlu2 %1919 }
 0x3a5   : > { %v1982_v19 = vpop.permute.xlu0 %1981 }
 0x3a6   : > { %v1998_v38 = vpop.permute.xlu1 %1997 }
 0x3ad   : > { %v1936_v28 = vpop.permute.xlu0 %1935 }
 0x3ae   : > { %v1951_v58 = vpop.permute.xlu1 %1950 }
 0x3b6   : > { %v1904_v11 = vpop.permute.xlu1 %1903 }
 0x3c9   : > { %v2000_v22 = vpop.permute.xlu2 %1999 }
 0x3ca   : > { %v2002_v47 = vsel %vm2001_vm0, %v1998_v38, %v2000_v22  ;;  %v2003_v50 = vsel %vm2001_vm0, %v2000_v22, %v1998_v38 }
 0x3cb   : > { %v2011_v61 = vmul.f32 %v2007_v39, %v2002_v47  ;;  %v2012_v17 = vmul.f32 %v2008_v14, %v2003_v50 }
 0x3cd   : > { %2037 = vmatpush.msra.mxu0 %v2011_v61  ;;  %2060 = vmatpush.msra.mxu1 %v2012_v17 }
 0x3d1   : > { %v1953_v55 = vpop.permute.xlu2 %1952 }
 0x3d2   : > { %v1954_v60 = vsel %vm628_vm6, %v1951_v58, %v1953_v55  ;;  %v1955_v18 = vsel %vm628_vm6, %v1953_v55, %v1951_v58  ;;  %vm2023_vm6 = vcmask 588800  }
 0x3d3   : > { %v1963_v3 = vmul.f32 %v1959_v32, %v1954_v60  ;;  %v1964_v31 = vmul.f32 %v1960_v57, %v1955_v18 }
 0x3d9   : > { %v1906_v13 = vpop.permute.xlu2 %1905 }
 0x3da   : > { %v1908_v40 = vsel %vm1907_vm5, %v1904_v11, %v1906_v13  ;;  %v1909_v8 = vsel %vm1907_vm5, %v1906_v13, %v1904_v11 }
 0x3db   : > { %v1917_v38 = vmul.f32 %v1913_v43, %v1909_v8 }
 0x3e1   : > { %v1968_v20 = vpop.permute.xlu0 %1967  ;;  %v2016_v58 = vpop.permute.xlu2 %2015 }
 0x3e2   : > { %v1984_v7 = vpop.permute.xlu1 %1983  ;;  %v1970_v37 = vsel %vm1969_vm1, %v1966_v12, %v1968_v20  ;;  %v1971_v59 = vsel %vm1969_vm1, %v1968_v20, %v1966_v12  ;;  %v1895_v12 = vld [vmem:[%s3459_s6] ss:$8 sm:$0x3] }
 0x3e3   : > { %v1986_v62 = vsel %vm1985_vm2, %v1982_v19, %v1984_v7  ;;  %v1987_v63 = vsel %vm1985_vm2, %v1984_v7, %v1982_v19  ;;  %v1979_v5 = vmul.f32 %v1975_v49, %v1970_v37  ;;  %v1980_v9 = vmul.f32 %v1976_v35, %v1971_v59  ;;  %v1884_v19 = vld [vmem:[%s3457_s4] sm:$0xff] }
 0x3e4   : > { %v1995_v36 = vmul.f32 %v1991_v45, %v1986_v62  ;;  %v1996_v34 = vmul.f32 %v1992_v0, %v1987_v63  ;;  %v1898_v39 = vperm.slane %v1895_v12, 1 }
 0x3e6   : > { %2038 = vmatpush.msra.mxu0 %v1995_v36  ;;  %2061 = vmatpush.msra.mxu1 %v1996_v34 }
 0x3e8   : > { %2039 = vmatpush.msra.mxu0 %v1979_v5  ;;  %2062 = vmatpush.msra.mxu1 %v1980_v9 }
 0x3e9   : > { %v1922_v27 = vpop.permute.xlu0 %1921 }
 0x3ea   : > { %2040 = vmatpush.msra.mxu0 %v1963_v3  ;;  %2063 = vmatpush.msra.mxu1 %v1964_v31  ;;  %v1938_v44 = vpop.permute.xlu1 %1937  ;;  %v1924_v10 = vsel %vm1923_vm3, %v3382_v29, %v1922_v27  ;;  %v1925_v15 = vsel %vm1923_vm3, %v1922_v27, %v3382_v29 }
 0x3eb   : > { %v1939_v51 = vsel %vm574_vm4, %v1936_v28, %v1938_v44  ;;  %v1940_v2 = vsel %vm574_vm4, %v1938_v44, %v1936_v28  ;;  %v1933_v29 = vmul.f32 %v1929_v23, %v1925_v15  ;;  %v1934_v52 = vmul.f32 %v1930_v54, %v1924_v10 }
 0x3ec   : > { %v1948_v4 = vmul.f32 %v1944_v6, %v1940_v2  ;;  %v1949_v21 = vmul.f32 %v1945_v1, %v1939_v51  ;;  %2041 = vmatpush.msra.mxu0 %v3358_v25  ;;  %2064 = vmatpush.msra.mxu1 %v3369_v42  ;;  %vm1892_vm4 = vcmp.lt.s32.totalorder %v2687_v26, 9  ;;  %v1918_v25 = vmul.f32 %v1914_v30, %v1908_v40  ;;  %v1885_v26 = vld [vmem:[%s3457_s4 + $0x8] sm:$0xff] }
 0x3ed   : > { %v1897_v42 = vperm.slane %v1895_v12, 0 }
 0x3ee   : > { %2042 = vmatpush.msra.mxu0 %v1948_v4  ;;  %2065 = vmatpush.msra.mxu1 %v1949_v21 }
 0x3f0   : > { %2043 = vmatpush.msra.mxu0 %v1933_v29  ;;  %2066 = vmatpush.msra.mxu1 %v1934_v52 }
 0x3f1   : > { %v1889_v14 = vpop.permute.xlu0 %1888 }
 0x3f2   : > { %2044 = vmatpush.msra.mxu0 %v1917_v38  ;;  %2067 = vmatpush.msra.mxu1 %v1918_v25  ;;  %v1891_v22 = vpop.permute.xlu1 %1890 }
 0x3f3   : > { %v1893_v47 = vsel %vm1892_vm4, %v1889_v14, %v1891_v22  ;;  %v1894_v50 = vsel %vm1892_vm4, %v1891_v22, %v1889_v14 }
 0x3f4   : > { %v1901_v61 = vmul.f32 %v1897_v42, %v1894_v50  ;;  %v1902_v17 = vmul.f32 %v1898_v39, %v1893_v47 }
 0x3f6   : > { %2045 = vmatpush.msra.mxu0 %v1901_v61  ;;  %2068 = vmatpush.msra.mxu1 %v1902_v17 }
 0x3f7   : > { %2245 = vmatmul.msk.f32.vlgmr.msra.gmra.mxu0 %vm2023_vm6, %v1884_v19  ;;  %2247 = vmatmul.msk.f32.vlgmr.msra.gmra.mxu1 %vm2023_vm6, %v1884_v19 }
 0x3f9   : > { %v2021_v55 = vpop.permute.xlu0 %2020 }
 0x3ff   : > { %2246 = vmatmul.msk.f32.gmra.mxu0 %vm2023_vm6, %v1885_v26  ;;  %2248 = vmatmul.msk.f32.gmra.mxu1 %vm2023_vm6, %v1885_v26 }
 0x474   : > { %v2047_v28 = vpop.f32.mrf.mxu0  ;;  %v2070_v11 = vpop.f32.mrf.mxu1 }
 0x475   : > { %v2048_v33 = vadd.f32 %v2047_v28, %v2016_v58  ;;  %v2071_v16 = vadd.f32 %v2070_v11, %v2016_v58 }
 0x477   : > { %v2076_v46 = vmax.f32 %v2048_v33, 0.0  ;;  %v2077_v24 = vmax.f32 %v2071_v16, 0.0 }
 0x479   : > { %2080 = vst [vmem:[%s374_s16] sm:$0xff] %v2076_v46 }
 0x47a   : > { %2081 = vst [vmem:[%s374_s16 + $0x8] sm:$0xff] %v2077_v24 }
 0x47c   : > { %v2050_v45 = vpop.f32.mrf.mxu0  ;;  %v2073_v0 = vpop.f32.mrf.mxu1 }
 0x47d   : > { %v2051_v53 = vadd.f32 %v2050_v45, %v2021_v55  ;;  %v2074_v20 = vadd.f32 %v2073_v0, %v2021_v55 }
 0x47f   : > { %v2078_v49 = vmax.f32 %v2051_v53, 0.0  ;;  %v2079_v35 = vmax.f32 %v2074_v20, 0.0 }
 0x481   : > { %2082 = vst [vmem:[%s374_s16 + $0x10] sm:$0xff] %v2078_v49 }
 0x482   : > { %2083 = vst [vmem:[%s374_s16 + $0x18] sm:$0xff] %v2079_v35 }
 0x483 PF: > { %s22_s30 = sadd.s32 1, %s2416_s30  }
 0x484   : > { %p19_p7 = scmp.ge.s32.totalorder %s22_s30, 4  }
 0x486   :  { %21 = sbr.rel (!%p19_p7) target bundleno = 2 (0x2), region = 117 }
 0x48b   :  { %2121 = vsyncpa [#allocation3], 1 }
 0x48c   :  { %2123 = vsyncpa [#allocation3 + $0x1], 1 }
 0x48d   :  { %2124 = vsyncpa [#allocation5], 1 }

</bundles_post_ra>
